<compile_context>
chip_gen: v5e
topology: v5e:2x2
jax: 0.10.0
libtpu: 0.0.40
codegen_flags: <defaults>
</compile_context>

<pallas_src>
import jax
import jax.numpy as jnp
from jax.experimental import pallas as pl
from jax.experimental.pallas import tpu as pltpu

LANE = 128


def lstm_mlp_kernel(x_ref, wih_ref, whh_ref, b_ref,
                    w1_ref, b1_ref, w2_ref, b2_ref, w3_ref, b3_ref,
                    out_ref):
    """x_ref is time-major (T, Bb, I).  Gate layout is i|f|o|g, each gate
    padded to a 128-lane stride."""
    T, Bb, _ = x_ref.shape
    Gp = b_ref.shape[1] // 4                        # padded per-gate width (128)

    # Hoist all weight/bias loads out of the unrolled loops (single vld each).
    w_ih = wih_ref[...]                             # (I, 4*Gp)
    w_hh = whh_ref[...]                             # (Gp, 4*Gp)
    b = b_ref[...]                                  # (1, 4*Gp)
    w1 = w1_ref[...]; b1 = b1_ref[...]
    w2 = w2_ref[...]; b2 = b2_ref[...]
    w3 = w3_ref[...]; b3 = b3_ref[...]

    # Input projections for every timestep.  Each is an independent 2-D matmul
    # (no dependence on h), so the LLO scheduler can pipeline all T MXU pushes
    # ahead of the serial recurrence.  Done per-step to avoid an in-kernel
    # (T,Bb,I)->(T*Bb,I) reshape (not a view -> sublane relayout copy).
    xp = [jnp.dot(x_ref[t], w_ih, preferred_element_type=jnp.float32) + b
          for t in range(T)]                        # list of (Bb, 4*Gp)

    h = jnp.zeros((Bb, Gp), jnp.float32)            # h0 = zeros (as in module)
    c = jnp.zeros((Bb, Gp), jnp.float32)            # c0 = zeros

    # T is tiny & static -> static unroll so the scheduler sees the whole chain.
    for t in range(T):
        z = xp[t] + jnp.dot(h, w_hh, preferred_element_type=jnp.float32)  # (Bb, 4*Gp)
        sig = jax.nn.sigmoid(z[:, : 3 * Gp])        # fused i|f|o sigmoid (one EUP pass)
        g_g = jnp.tanh(z[:, 3 * Gp:])               # g gate
        i_g = sig[:, :Gp]                           # 128-lane-aligned slices:
        f_g = sig[:, Gp:2 * Gp]                     # pure vreg-boundary selects
        o_g = sig[:, 2 * Gp:]
        c = f_g * c + i_g * g_g                     # pad lanes stay exactly 0
        h = o_g * jnp.tanh(c)

    # MLP head on the final hidden state (lstm_out[:, -1, :] == final h).
    out = jnp.maximum(
        jnp.dot(h, w1, preferred_element_type=jnp.float32) + b1, 0.0)
    out = jnp.maximum(
        jnp.dot(out, w2, preferred_element_type=jnp.float32) + b2, 0.0)
    out_ref[...] = jnp.dot(out, w3, preferred_element_type=jnp.float32) + b3


def lstm_forward(x, p, *, output_size, block_b=None):
    """x: (B, T, I) batch-first (PyTorch layout). p: packed, lane-padded params."""
    B, T, I = x.shape
    Gp = p["w_hh"].shape[0]                         # padded per-gate width
    H4 = p["w_hh"].shape[1]                         # 4 * Gp
    h2p = p["w1"].shape[1]
    outp = p["w3"].shape[1]

    # Time-major layout for the kernel (layout plumbing stays outside).
    x_t = jnp.transpose(x.astype(jnp.float32), (1, 0, 2))     # (T, B, I)

    if block_b is None:
        # Split into exactly 2 sublane-aligned batch blocks only when the batch
        # is big enough -> non-degenerate "parallel" axis feeds both v7x TCs.
        # At small B a single block keeps grid steps (fixed ~0.35us each) to 1.
        if B >= 16 and B % 16 == 0:
            block_b = B // 2
        else:
            block_b = B
    grid = (pl.cdiv(B, block_b),)

    def full(shape):
        return pl.BlockSpec(shape, lambda i, _s=len(shape): (0,) * _s)

    in_specs = [
        pl.BlockSpec((T, block_b, I), lambda i: (0, i, 0)),    # x, blocked on batch
        full((I, H4)),                                         # W_ih fused+padded
        full((Gp, H4)),                                        # W_hh fused+padded
        full((1, H4)),                                         # bias fused+padded
        full((Gp, h2p)), full((1, h2p)),                       # fc1 (padded)
        full((h2p, h2p)), full((1, h2p)),                      # fc2 (padded)
        full((h2p, outp)), full((1, outp)),                    # fc3 (padded)
    ]
    out_specs = pl.BlockSpec((block_b, outp), lambda i: (i, 0))

    out_pad = pl.pallas_call(
        lstm_mlp_kernel,
        out_shape=jax.ShapeDtypeStruct((B, outp), jnp.float32),
        grid=grid,
        in_specs=in_specs,
        out_specs=out_specs,
        compiler_params=pltpu.CompilerParams(
            dimension_semantics=("parallel",),       # batch axis -> both TCs on v7x
            vmem_limit_bytes=32 * 1024 * 1024),      # explicit, safe on v7x's 64 MiB
    )(x_t, p["w_ih"], p["w_hh"], p["b"],
      p["w1"], p["b1"], p["w2"], p["b2"], p["w3"], p["b3"])

    # Lane-dense kernel output (last dim = multiple of 128); real slice outside.
    return out_pad[:, :output_size]


# ----------------------------- parameters -----------------------------------

def init_raw_params(key, input_size, hidden_size, output_size):
    """PyTorch-shaped params: weight_ih (4H,I), weight_hh (4H,H), biases (4H,),
    Linear weights (out,in)/biases (out,), with PyTorch-style uniform init."""
    ks = jax.random.split(key, 10)
    H = hidden_size
    h2 = H // 2
    kl = 1.0 / float(H) ** 0.5
    kf1 = 1.0 / float(H) ** 0.5
    kf2 = 1.0 / float(h2) ** 0.5
    return dict(
        w_ih=jax.random.uniform(ks[0], (4 * H, input_size), jnp.float32, -kl, kl),
        w_hh=jax.random.uniform(ks[1], (4 * H, H), jnp.float32, -kl, kl),
        b_ih=jax.random.uniform(ks[2], (4 * H,), jnp.float32, -kl, kl),
        b_hh=jax.random.uniform(ks[3], (4 * H,), jnp.float32, -kl, kl),
        fc1_w=jax.random.uniform(ks[4], (h2, H), jnp.float32, -kf1, kf1),
        fc1_b=jax.random.uniform(ks[5], (h2,), jnp.float32, -kf1, kf1),
        fc2_w=jax.random.uniform(ks[6], (h2, h2), jnp.float32, -kf2, kf2),
        fc2_b=jax.random.uniform(ks[7], (h2,), jnp.float32, -kf2, kf2),
        fc3_w=jax.random.uniform(ks[8], (output_size, h2), jnp.float32, -kf2, kf2),
        fc3_b=jax.random.uniform(ks[9], (output_size,), jnp.float32, -kf2, kf2),
    )


def _round_up_lane(n):
    return max(LANE, ((n + LANE - 1) // LANE) * LANE)


def pack_params(raw, hidden_size):
    """Fuse the 4 LSTM gate matrices into single stacked matrices, reorder
    PyTorch's (i,f,g,o) gate order to (i,f,o,g) so the sigmoid gates form one
    contiguous block, and zero-pad every gate / MLP output to a 128-lane
    stride so all in-kernel slices and stores are vreg-aligned and lane-dense.
    The zero padding is exact (pad lanes contribute 0 to every dot product)."""
    H = hidden_size
    Hp = _round_up_lane(H)
    h2 = raw["fc1_w"].shape[0]
    h2p = _round_up_lane(h2)
    out_size = raw["fc3_w"].shape[0]
    outp = _round_up_lane(out_size)

    def gate_pack(w):                      # w: (4H, X), PyTorch order i,f,g,o
        i, f, g, o = jnp.split(w, 4, axis=0)
        cols = [jnp.pad(x.T, ((0, 0), (0, Hp - H))) for x in (i, f, o, g)]
        return jnp.concatenate(cols, axis=1)           # (X, 4*Hp)

    w_ih = gate_pack(raw["w_ih"])                                    # (I, 4*Hp)
    w_hh = jnp.pad(gate_pack(raw["w_hh"]), ((0, Hp - H), (0, 0)))    # (Hp, 4*Hp)

    bias = raw["b_ih"] + raw["b_hh"]                                 # (4H,)
    bi, bf, bg, bo = jnp.split(bias, 4)
    b = jnp.concatenate(
        [jnp.pad(v, (0, Hp - H)) for v in (bi, bf, bo, bg)]).reshape(1, 4 * Hp)

    def pad2(a, r, c):
        return jnp.pad(a, ((0, r - a.shape[0]), (0, c - a.shape[1])))

    return dict(
        w_ih=w_ih, w_hh=w_hh, b=b,
        w1=pad2(raw["fc1_w"].T, Hp, h2p),
        b1=jnp.pad(raw["fc1_b"], (0, h2p - h2)).reshape(1, h2p),
        w2=pad2(raw["fc2_w"].T, h2p, h2p),
        b2=jnp.pad(raw["fc2_b"], (0, h2p - h2)).reshape(1, h2p),
        w3=pad2(raw["fc3_w"].T, h2p, outp),
        b3=jnp.pad(raw["fc3_b"], (0, outp - out_size)).reshape(1, outp),
    )


# ----------------------------- reference ------------------------------------

def reference_forward(x, raw, hidden_size):
    """Pure-JAX reference in PyTorch layout & gate order (i,f,g,o)."""
    x = x.astype(jnp.float32)
    B, T, _ = x.shape
    H = hidden_size
    W_ih, W_hh = raw["w_ih"], raw["w_hh"]
    bias = raw["b_ih"] + raw["b_hh"]
    h = jnp.zeros((B, H), jnp.float32)
    c = jnp.zeros((B, H), jnp.float32)
    for t in range(T):
        xt = x[:, t, :]
        z = xt @ W_ih.T + h @ W_hh.T + bias                      # (B, 4H)
        i_g = jax.nn.sigmoid(z[:, :H])
        f_g = jax.nn.sigmoid(z[:, H:2 * H])
        g_g = jnp.tanh(z[:, 2 * H:3 * H])
        o_g = jax.nn.sigmoid(z[:, 3 * H:])
        c = f_g * c + i_g * g_g
        h = o_g * jnp.tanh(c)
    out = jnp.maximum(h @ raw["fc1_w"].T + raw["fc1_b"], 0.0)
    out = jnp.maximum(out @ raw["fc2_w"].T + raw["fc2_b"], 0.0)
    return out @ raw["fc3_w"].T + raw["fc3_b"]


if __name__ == "__main__":
    batch_size = 2
    seq_len = 4
    input_size = 4
    hidden_size = 20
    output_size = 2

    key = jax.random.PRNGKey(0)
    kx, kp = jax.random.split(key)
    x = jax.random.normal(kx, (batch_size, seq_len, input_size), jnp.float32)

    raw = init_raw_params(kp, input_size, hidden_size, output_size)
    packed = pack_params(raw, hidden_size)

    out = lstm_forward(x, packed, output_size=output_size)
    out = jax.block_until_ready(out)

    ref = reference_forward(x, raw, hidden_size)
    assert out.shape == (batch_size, output_size)
    assert jnp.allclose(out, ref, atol=1e-4, rtol=1e-4)
    print("KERNEL_OK")
</pallas_src>

<mosaic_0001>
module attributes {stable_mosaic.version = 11 : i64} {
  func.func @lstm_mlp_kernel(%arg0: i32, %arg1: memref<4x2x4xf32, #tpu.memory_space<vmem>>, %arg2: memref<4x512xf32, #tpu.memory_space<vmem>>, %arg3: memref<128x512xf32, #tpu.memory_space<vmem>>, %arg4: memref<1x512xf32, #tpu.memory_space<vmem>>, %arg5: memref<128x128xf32, #tpu.memory_space<vmem>>, %arg6: memref<1x128xf32, #tpu.memory_space<vmem>>, %arg7: memref<128x128xf32, #tpu.memory_space<vmem>>, %arg8: memref<1x128xf32, #tpu.memory_space<vmem>>, %arg9: memref<128x128xf32, #tpu.memory_space<vmem>>, %arg10: memref<1x128xf32, #tpu.memory_space<vmem>>, %arg11: memref<2x128xf32, #tpu.memory_space<vmem>>) attributes {dimension_semantics = [#tpu.dimension_semantics<parallel>], iteration_bounds = array<i64: 1>, scalar_prefetch = 0 : i64, scratch_operands = 0 : i64, tpu.core_type = #tpu.core_type<tc>, window_params = [{transform_indices = @transform_0, window_bounds = array<i64: 4, 2, 4>}, {pipeline_mode = #tpu.pipeline_mode<synchronous>, transform_indices = @transform_1, window_bounds = array<i64: 4, 512>}, {pipeline_mode = #tpu.pipeline_mode<synchronous>, transform_indices = @transform_2, window_bounds = array<i64: 128, 512>}, {pipeline_mode = #tpu.pipeline_mode<synchronous>, transform_indices = @transform_3, window_bounds = array<i64: 1, 512>}, {pipeline_mode = #tpu.pipeline_mode<synchronous>, transform_indices = @transform_4, window_bounds = array<i64: 128, 128>}, {pipeline_mode = #tpu.pipeline_mode<synchronous>, transform_indices = @transform_5, window_bounds = array<i64: 1, 128>}, {pipeline_mode = #tpu.pipeline_mode<synchronous>, transform_indices = @transform_6, window_bounds = array<i64: 128, 128>}, {pipeline_mode = #tpu.pipeline_mode<synchronous>, transform_indices = @transform_7, window_bounds = array<i64: 1, 128>}, {pipeline_mode = #tpu.pipeline_mode<synchronous>, transform_indices = @transform_8, window_bounds = array<i64: 128, 128>}, {pipeline_mode = #tpu.pipeline_mode<synchronous>, transform_indices = @transform_9, window_bounds = array<i64: 1, 128>}, {transform_indices = @transform_10, window_bounds = array<i64: 2, 128>}]} {
    %c0 = arith.constant 0 : index
    %c0_0 = arith.constant 0 : index
    %0 = vector.load %arg2[%c0, %c0_0] : memref<4x512xf32, #tpu.memory_space<vmem>>, vector<4x512xf32>
    %c0_1 = arith.constant 0 : index
    %c0_2 = arith.constant 0 : index
    %1 = vector.load %arg3[%c0_1, %c0_2] : memref<128x512xf32, #tpu.memory_space<vmem>>, vector<128x512xf32>
    %c0_3 = arith.constant 0 : index
    %c0_4 = arith.constant 0 : index
    %2 = vector.load %arg4[%c0_3, %c0_4] : memref<1x512xf32, #tpu.memory_space<vmem>>, vector<1x512xf32>
    %c0_5 = arith.constant 0 : index
    %c0_6 = arith.constant 0 : index
    %3 = vector.load %arg5[%c0_5, %c0_6] : memref<128x128xf32, #tpu.memory_space<vmem>>, vector<128x128xf32>
    %c0_7 = arith.constant 0 : index
    %c0_8 = arith.constant 0 : index
    %4 = vector.load %arg6[%c0_7, %c0_8] : memref<1x128xf32, #tpu.memory_space<vmem>>, vector<1x128xf32>
    %c0_9 = arith.constant 0 : index
    %c0_10 = arith.constant 0 : index
    %5 = vector.load %arg7[%c0_9, %c0_10] : memref<128x128xf32, #tpu.memory_space<vmem>>, vector<128x128xf32>
    %c0_11 = arith.constant 0 : index
    %c0_12 = arith.constant 0 : index
    %6 = vector.load %arg8[%c0_11, %c0_12] : memref<1x128xf32, #tpu.memory_space<vmem>>, vector<1x128xf32>
    %c0_13 = arith.constant 0 : index
    %c0_14 = arith.constant 0 : index
    %7 = vector.load %arg9[%c0_13, %c0_14] : memref<128x128xf32, #tpu.memory_space<vmem>>, vector<128x128xf32>
    %c0_15 = arith.constant 0 : index
    %c0_16 = arith.constant 0 : index
    %8 = vector.load %arg10[%c0_15, %c0_16] : memref<1x128xf32, #tpu.memory_space<vmem>>, vector<1x128xf32>
    %c0_17 = arith.constant 0 : index
    %c0_18 = arith.constant 0 : index
    %c0_19 = arith.constant 0 : index
    %9 = vector.load %arg1[%c0_17, %c0_18, %c0_19] : memref<4x2x4xf32, #tpu.memory_space<vmem>>, vector<1x2x4xf32>
    %10 = vector.shape_cast %9 : vector<1x2x4xf32> to vector<2x4xf32>
    %cst = arith.constant dense<0.000000e+00> : vector<2x512xf32>
    %11 = tpu.matmul %10, %0, %cst {dimension_numbers = #tpu.dot_dimension_numbers<[1], [0], [0], [1], [0, 0, 1, 1], [], []>} : vector<2x4xf32>, vector<4x512xf32>, vector<2x512xf32> -> vector<2x512xf32>
    %12 = vector.broadcast %2 : vector<1x512xf32> to vector<2x512xf32>
    %13 = arith.addf %11, %12 : vector<2x512xf32>
    %c1 = arith.constant 1 : index
    %c0_20 = arith.constant 0 : index
    %c0_21 = arith.constant 0 : index
    %14 = vector.load %arg1[%c1, %c0_20, %c0_21] : memref<4x2x4xf32, #tpu.memory_space<vmem>>, vector<1x2x4xf32>
    %15 = vector.shape_cast %14 : vector<1x2x4xf32> to vector<2x4xf32>
    %cst_22 = arith.constant dense<0.000000e+00> : vector<2x512xf32>
    %16 = tpu.matmul %15, %0, %cst_22 {dimension_numbers = #tpu.dot_dimension_numbers<[1], [0], [0], [1], [0, 0, 1, 1], [], []>} : vector<2x4xf32>, vector<4x512xf32>, vector<2x512xf32> -> vector<2x512xf32>
    %17 = vector.broadcast %2 : vector<1x512xf32> to vector<2x512xf32>
    %18 = arith.addf %16, %17 : vector<2x512xf32>
    %c2 = arith.constant 2 : index
    %c0_23 = arith.constant 0 : index
    %c0_24 = arith.constant 0 : index
    %19 = vector.load %arg1[%c2, %c0_23, %c0_24] : memref<4x2x4xf32, #tpu.memory_space<vmem>>, vector<1x2x4xf32>
    %20 = vector.shape_cast %19 : vector<1x2x4xf32> to vector<2x4xf32>
    %cst_25 = arith.constant dense<0.000000e+00> : vector<2x512xf32>
    %21 = tpu.matmul %20, %0, %cst_25 {dimension_numbers = #tpu.dot_dimension_numbers<[1], [0], [0], [1], [0, 0, 1, 1], [], []>} : vector<2x4xf32>, vector<4x512xf32>, vector<2x512xf32> -> vector<2x512xf32>
    %22 = vector.broadcast %2 : vector<1x512xf32> to vector<2x512xf32>
    %23 = arith.addf %21, %22 : vector<2x512xf32>
    %c3 = arith.constant 3 : index
    %c0_26 = arith.constant 0 : index
    %c0_27 = arith.constant 0 : index
    %24 = vector.load %arg1[%c3, %c0_26, %c0_27] : memref<4x2x4xf32, #tpu.memory_space<vmem>>, vector<1x2x4xf32>
    %25 = vector.shape_cast %24 : vector<1x2x4xf32> to vector<2x4xf32>
    %cst_28 = arith.constant dense<0.000000e+00> : vector<2x512xf32>
    %26 = tpu.matmul %25, %0, %cst_28 {dimension_numbers = #tpu.dot_dimension_numbers<[1], [0], [0], [1], [0, 0, 1, 1], [], []>} : vector<2x4xf32>, vector<4x512xf32>, vector<2x512xf32> -> vector<2x512xf32>
    %27 = vector.broadcast %2 : vector<1x512xf32> to vector<2x512xf32>
    %28 = arith.addf %26, %27 : vector<2x512xf32>
    %cst_29 = arith.constant 0.000000e+00 : f32
    %29 = vector.broadcast %cst_29 : f32 to vector<2x128xf32>
    %cst_30 = arith.constant 0.000000e+00 : f32
    %30 = vector.broadcast %cst_30 : f32 to vector<2x128xf32>
    %cst_31 = arith.constant dense<0.000000e+00> : vector<2x512xf32>
    %31 = tpu.matmul %29, %1, %cst_31 {dimension_numbers = #tpu.dot_dimension_numbers<[1], [0], [0], [1], [0, 0, 1, 1], [], []>} : vector<2x128xf32>, vector<128x512xf32>, vector<2x512xf32> -> vector<2x512xf32>
    %32 = arith.addf %13, %31 : vector<2x512xf32>
    %33 = vector.extract_strided_slice %32 {offsets = [0, 0], sizes = [2, 384], strides = [1, 1]} : vector<2x512xf32> to vector<2x384xf32>
    %34 = arith.negf %33 : vector<2x384xf32>
    %35 = math.exp %34 : vector<2x384xf32>
    %cst_32 = arith.constant 1.000000e+00 : f32
    %36 = vector.broadcast %cst_32 : f32 to vector<2x384xf32>
    %37 = arith.addf %36, %35 : vector<2x384xf32>
    %38 = arith.divf %36, %37 : vector<2x384xf32>
    %39 = vector.extract_strided_slice %32 {offsets = [0, 384], sizes = [2, 128], strides = [1, 1]} : vector<2x512xf32> to vector<2x128xf32>
    %40 = math.tanh %39 : vector<2x128xf32>
    %41 = vector.extract_strided_slice %38 {offsets = [0, 0], sizes = [2, 128], strides = [1, 1]} : vector<2x384xf32> to vector<2x128xf32>
    %42 = vector.extract_strided_slice %38 {offsets = [0, 128], sizes = [2, 128], strides = [1, 1]} : vector<2x384xf32> to vector<2x128xf32>
    %43 = vector.extract_strided_slice %38 {offsets = [0, 256], sizes = [2, 128], strides = [1, 1]} : vector<2x384xf32> to vector<2x128xf32>
    %44 = arith.mulf %42, %30 : vector<2x128xf32>
    %45 = arith.mulf %41, %40 : vector<2x128xf32>
    %46 = arith.addf %44, %45 : vector<2x128xf32>
    %47 = math.tanh %46 : vector<2x128xf32>
    %48 = arith.mulf %43, %47 : vector<2x128xf32>
    %cst_33 = arith.constant dense<0.000000e+00> : vector<2x512xf32>
    %49 = tpu.matmul %48, %1, %cst_33 {dimension_numbers = #tpu.dot_dimension_numbers<[1], [0], [0], [1], [0, 0, 1, 1], [], []>} : vector<2x128xf32>, vector<128x512xf32>, vector<2x512xf32> -> vector<2x512xf32>
    %50 = arith.addf %18, %49 : vector<2x512xf32>
    %51 = vector.extract_strided_slice %50 {offsets = [0, 0], sizes = [2, 384], strides = [1, 1]} : vector<2x512xf32> to vector<2x384xf32>
    %52 = arith.negf %51 : vector<2x384xf32>
    %53 = math.exp %52 : vector<2x384xf32>
    %cst_34 = arith.constant 1.000000e+00 : f32
    %54 = vector.broadcast %cst_34 : f32 to vector<2x384xf32>
    %55 = arith.addf %54, %53 : vector<2x384xf32>
    %56 = arith.divf %54, %55 : vector<2x384xf32>
    %57 = vector.extract_strided_slice %50 {offsets = [0, 384], sizes = [2, 128], strides = [1, 1]} : vector<2x512xf32> to vector<2x128xf32>
    %58 = math.tanh %57 : vector<2x128xf32>
    %59 = vector.extract_strided_slice %56 {offsets = [0, 0], sizes = [2, 128], strides = [1, 1]} : vector<2x384xf32> to vector<2x128xf32>
    %60 = vector.extract_strided_slice %56 {offsets = [0, 128], sizes = [2, 128], strides = [1, 1]} : vector<2x384xf32> to vector<2x128xf32>
    %61 = vector.extract_strided_slice %56 {offsets = [0, 256], sizes = [2, 128], strides = [1, 1]} : vector<2x384xf32> to vector<2x128xf32>
    %62 = arith.mulf %60, %46 : vector<2x128xf32>
    %63 = arith.mulf %59, %58 : vector<2x128xf32>
    %64 = arith.addf %62, %63 : vector<2x128xf32>
    %65 = math.tanh %64 : vector<2x128xf32>
    %66 = arith.mulf %61, %65 : vector<2x128xf32>
    %cst_35 = arith.constant dense<0.000000e+00> : vector<2x512xf32>
    %67 = tpu.matmul %66, %1, %cst_35 {dimension_numbers = #tpu.dot_dimension_numbers<[1], [0], [0], [1], [0, 0, 1, 1], [], []>} : vector<2x128xf32>, vector<128x512xf32>, vector<2x512xf32> -> vector<2x512xf32>
    %68 = arith.addf %23, %67 : vector<2x512xf32>
    %69 = vector.extract_strided_slice %68 {offsets = [0, 0], sizes = [2, 384], strides = [1, 1]} : vector<2x512xf32> to vector<2x384xf32>
    %70 = arith.negf %69 : vector<2x384xf32>
    %71 = math.exp %70 : vector<2x384xf32>
    %cst_36 = arith.constant 1.000000e+00 : f32
    %72 = vector.broadcast %cst_36 : f32 to vector<2x384xf32>
    %73 = arith.addf %72, %71 : vector<2x384xf32>
    %74 = arith.divf %72, %73 : vector<2x384xf32>
    %75 = vector.extract_strided_slice %68 {offsets = [0, 384], sizes = [2, 128], strides = [1, 1]} : vector<2x512xf32> to vector<2x128xf32>
    %76 = math.tanh %75 : vector<2x128xf32>
    %77 = vector.extract_strided_slice %74 {offsets = [0, 0], sizes = [2, 128], strides = [1, 1]} : vector<2x384xf32> to vector<2x128xf32>
    %78 = vector.extract_strided_slice %74 {offsets = [0, 128], sizes = [2, 128], strides = [1, 1]} : vector<2x384xf32> to vector<2x128xf32>
    %79 = vector.extract_strided_slice %74 {offsets = [0, 256], sizes = [2, 128], strides = [1, 1]} : vector<2x384xf32> to vector<2x128xf32>
    %80 = arith.mulf %78, %64 : vector<2x128xf32>
    %81 = arith.mulf %77, %76 : vector<2x128xf32>
    %82 = arith.addf %80, %81 : vector<2x128xf32>
    %83 = math.tanh %82 : vector<2x128xf32>
    %84 = arith.mulf %79, %83 : vector<2x128xf32>
    %cst_37 = arith.constant dense<0.000000e+00> : vector<2x512xf32>
    %85 = tpu.matmul %84, %1, %cst_37 {dimension_numbers = #tpu.dot_dimension_numbers<[1], [0], [0], [1], [0, 0, 1, 1], [], []>} : vector<2x128xf32>, vector<128x512xf32>, vector<2x512xf32> -> vector<2x512xf32>
    %86 = arith.addf %28, %85 : vector<2x512xf32>
    %87 = vector.extract_strided_slice %86 {offsets = [0, 0], sizes = [2, 384], strides = [1, 1]} : vector<2x512xf32> to vector<2x384xf32>
    %88 = arith.negf %87 : vector<2x384xf32>
    %89 = math.exp %88 : vector<2x384xf32>
    %cst_38 = arith.constant 1.000000e+00 : f32
    %90 = vector.broadcast %cst_38 : f32 to vector<2x384xf32>
    %91 = arith.addf %90, %89 : vector<2x384xf32>
    %92 = arith.divf %90, %91 : vector<2x384xf32>
    %93 = vector.extract_strided_slice %86 {offsets = [0, 384], sizes = [2, 128], strides = [1, 1]} : vector<2x512xf32> to vector<2x128xf32>
    %94 = math.tanh %93 : vector<2x128xf32>
    %95 = vector.extract_strided_slice %92 {offsets = [0, 0], sizes = [2, 128], strides = [1, 1]} : vector<2x384xf32> to vector<2x128xf32>
    %96 = vector.extract_strided_slice %92 {offsets = [0, 128], sizes = [2, 128], strides = [1, 1]} : vector<2x384xf32> to vector<2x128xf32>
    %97 = vector.extract_strided_slice %92 {offsets = [0, 256], sizes = [2, 128], strides = [1, 1]} : vector<2x384xf32> to vector<2x128xf32>
    %98 = arith.mulf %96, %82 : vector<2x128xf32>
    %99 = arith.mulf %95, %94 : vector<2x128xf32>
    %100 = arith.addf %98, %99 : vector<2x128xf32>
    %101 = math.tanh %100 : vector<2x128xf32>
    %102 = arith.mulf %97, %101 : vector<2x128xf32>
    %cst_39 = arith.constant dense<0.000000e+00> : vector<2x128xf32>
    %103 = tpu.matmul %102, %3, %cst_39 {dimension_numbers = #tpu.dot_dimension_numbers<[1], [0], [0], [1], [0, 0, 1, 1], [], []>} : vector<2x128xf32>, vector<128x128xf32>, vector<2x128xf32> -> vector<2x128xf32>
    %104 = vector.broadcast %4 : vector<1x128xf32> to vector<2x128xf32>
    %105 = arith.addf %103, %104 : vector<2x128xf32>
    %cst_40 = arith.constant 0.000000e+00 : f32
    %106 = vector.broadcast %cst_40 : f32 to vector<2x128xf32>
    %107 = arith.maximumf %105, %106 : vector<2x128xf32>
    %cst_41 = arith.constant dense<0.000000e+00> : vector<2x128xf32>
    %108 = tpu.matmul %107, %5, %cst_41 {dimension_numbers = #tpu.dot_dimension_numbers<[1], [0], [0], [1], [0, 0, 1, 1], [], []>} : vector<2x128xf32>, vector<128x128xf32>, vector<2x128xf32> -> vector<2x128xf32>
    %109 = vector.broadcast %6 : vector<1x128xf32> to vector<2x128xf32>
    %110 = arith.addf %108, %109 : vector<2x128xf32>
    %cst_42 = arith.constant 0.000000e+00 : f32
    %111 = vector.broadcast %cst_42 : f32 to vector<2x128xf32>
    %112 = arith.maximumf %110, %111 : vector<2x128xf32>
    %cst_43 = arith.constant dense<0.000000e+00> : vector<2x128xf32>
    %113 = tpu.matmul %112, %7, %cst_43 {dimension_numbers = #tpu.dot_dimension_numbers<[1], [0], [0], [1], [0, 0, 1, 1], [], []>} : vector<2x128xf32>, vector<128x128xf32>, vector<2x128xf32> -> vector<2x128xf32>
    %114 = vector.broadcast %8 : vector<1x128xf32> to vector<2x128xf32>
    %115 = arith.addf %113, %114 : vector<2x128xf32>
    %c0_44 = arith.constant 0 : index
    %c0_45 = arith.constant 0 : index
    %116 = vector.load %arg11[%c0_44, %c0_45] : memref<2x128xf32, #tpu.memory_space<vmem>>, vector<2x128xf32>
    tpu.vector_store %arg11[%c0_44, %c0_45], %115 {strides = array<i32>} : memref<2x128xf32, #tpu.memory_space<vmem>>, vector<2x128xf32>,
    return
  }
  func.func @transform_0(%arg0: i32) -> (i32, i32, i32) {
    %c0_i32 = arith.constant 0 : i32
    %c0_i32_0 = arith.constant 0 : i32
    %c0_i32_1 = arith.constant 0 : i32
    return %c0_i32, %arg0, %c0_i32_0 : i32, i32, i32
  }
  func.func @transform_1(%arg0: i32) -> (i32, i32) {
    %c0_i32 = arith.constant 0 : i32
    %c0_i32_0 = arith.constant 0 : i32
    %c0_i32_1 = arith.constant 0 : i32
    return %c0_i32, %c0_i32_0 : i32, i32
  }
  func.func @transform_2(%arg0: i32) -> (i32, i32) {
    %c0_i32 = arith.constant 0 : i32
    %c0_i32_0 = arith.constant 0 : i32
    %c0_i32_1 = arith.constant 0 : i32
    return %c0_i32, %c0_i32_0 : i32, i32
  }
  func.func @transform_3(%arg0: i32) -> (i32, i32) {
    %c0_i32 = arith.constant 0 : i32
    %c0_i32_0 = arith.constant 0 : i32
    %c0_i32_1 = arith.constant 0 : i32
    return %c0_i32, %c0_i32_0 : i32, i32
  }
  func.func @transform_4(%arg0: i32) -> (i32, i32) {
    %c0_i32 = arith.constant 0 : i32
    %c0_i32_0 = arith.constant 0 : i32
    %c0_i32_1 = arith.constant 0 : i32
    return %c0_i32, %c0_i32_0 : i32, i32
  }
  func.func @transform_5(%arg0: i32) -> (i32, i32) {
    %c0_i32 = arith.constant 0 : i32
    %c0_i32_0 = arith.constant 0 : i32
    %c0_i32_1 = arith.constant 0 : i32
    return %c0_i32, %c0_i32_0 : i32, i32
  }
  func.func @transform_6(%arg0: i32) -> (i32, i32) {
    %c0_i32 = arith.constant 0 : i32
    %c0_i32_0 = arith.constant 0 : i32
    %c0_i32_1 = arith.constant 0 : i32
    return %c0_i32, %c0_i32_0 : i32, i32
  }
  func.func @transform_7(%arg0: i32) -> (i32, i32) {
    %c0_i32 = arith.constant 0 : i32
    %c0_i32_0 = arith.constant 0 : i32
    %c0_i32_1 = arith.constant 0 : i32
    return %c0_i32, %c0_i32_0 : i32, i32
  }
  func.func @transform_8(%arg0: i32) -> (i32, i32) {
    %c0_i32 = arith.constant 0 : i32
    %c0_i32_0 = arith.constant 0 : i32
    %c0_i32_1 = arith.constant 0 : i32
    return %c0_i32, %c0_i32_0 : i32, i32
  }
  func.func @transform_9(%arg0: i32) -> (i32, i32) {
    %c0_i32 = arith.constant 0 : i32
    %c0_i32_0 = arith.constant 0 : i32
    %c0_i32_1 = arith.constant 0 : i32
    return %c0_i32, %c0_i32_0 : i32, i32
  }
  func.func @transform_10(%arg0: i32) -> (i32, i32) {
    %c0_i32 = arith.constant 0 : i32
    %c0_i32_0 = arith.constant 0 : i32
    return %arg0, %c0_i32 : i32, i32
  }
}

</mosaic_0001>

<bundles_post_ra>
// kernel: tpu_custom_call.1
= control target key start
LH: loop header
LB: loop body
LE: loop exit
PB: predicated region body
PF: predicated region fallthrough
CT: control target
= control target key end

     0   :  { %15 = vsyncpa [#allocation3], 0  ;;  %s2278_s0 = inlined_call_operand.hbm [shape: f32[4,2,4], index: 0, kind: input, shape index: {}]   ;;  %s2279_s1 = inlined_call_operand.hbm [shape: f32[4,512], index: 1, kind: input, shape index: {}]   ;;  %s2280_s2 = inlined_call_operand.hbm [shape: f32[128,512], index: 2, kind: input, shape index: {}]   ;;  %s2281_s3 = inlined_call_operand.hbm [shape: f32[1,512], index: 3, kind: input, shape index: {}]   ;;  %s2282_s4 = inlined_call_operand.hbm [shape: f32[128,128], index: 4, kind: input, shape index: {}]   ;;  %s2283_s5 = inlined_call_operand.vmem [shape: f32[1,128], index: 5, kind: input, shape index: {}]   ;;  %s2284_s6 = inlined_call_operand.hbm [shape: f32[128,128], index: 6, kind: input, shape index: {}]   ;;  %s2285_s7 = inlined_call_operand.vmem [shape: f32[1,128], index: 7, kind: input, shape index: {}]   ;;  %s2286_s8 = inlined_call_operand.hbm [shape: f32[128,128], index: 8, kind: input, shape index: {}]   ;;  %s2287_s9 = inlined_call_operand.vmem [shape: f32[1,128], index: 9, kind: input, shape index: {}]   ;;  %s2288_s10 = inlined_call_operand.hbm [shape: f32[2,128], index: 10, kind: output, shape index: {}]  }
   0x1   :  { %16 = vsyncpa [#allocation6], 0 }
   0x2   :  { %17 = vsyncpa [#allocation9], 0 }
   0x3   :  { %18 = vsyncpa [#allocation12], 0  ;;  %s38_s15 = sshll.u32 %s2279_s1, 4  ;;  %s39_s15 = int_to_ptr.hbm [resolvable:$true] %s38_s15 }
   0x4   :  { %19 = vsyncpa [#allocation4], 0  ;;  %s1678_s16 = smov [#allocation5]   ;;  %s62_s20 = sshll.u32 %s2281_s3, 4  ;;  %s63_s20 = int_to_ptr.hbm [resolvable:$true] %s62_s20 }
   0x5   :  { %s40_s17 = sshll.u32 %s1678_s16, 4  ;;  %s1679_s21 = smov [#allocation8]   ;;  %s41_s17 = int_to_ptr.vmem [resolvable:$true] %s40_s17 }
   0x6   :  { %43 = dma.hbm_to_vmem [thread:$0]  %s39_s15, 256, %s41_s17, [#allocation6]  }
   0x7   :  { %s64_s22 = sshll.u32 %s1679_s21, 4  ;;  %s87_s25 = sshll.u32 %s2284_s6, 4  ;;  %s65_s22 = int_to_ptr.vmem [resolvable:$true] %s64_s22  ;;  %s88_s25 = int_to_ptr.hbm [resolvable:$true] %s87_s25 }
   0x8   :  { %67 = dma.hbm_to_vmem [thread:$0]  %s63_s20, 64, %s65_s22, [#allocation9]  }
   0x9   :  { %s1680_s1 = smov [#allocation11]   ;;  %s24_s29 = sshll.u32 %s2278_s0, 4  ;;  %s25_s29 = int_to_ptr.hbm [resolvable:$true] %s24_s29 }
   0xa   :  { %s89_s26 = sshll.u32 %s1680_s1, 4  ;;  %s1681_s30 = smov 128   ;;  %s90_s26 = int_to_ptr.vmem [resolvable:$true] %s89_s26 }
   0xb   :  { %s1682_s3 = smov 8   ;;  %s1683_s11 = smov [#allocation2]  }
   0xc   :  { %95 = dma.hbm_to_vmem [thread:$0]  %s88_s25, 2048, %s90_s26, [#allocation12], %s1681_s30, %s1681_s30, %s1682_s3  }
   0xd   :  { %s26_s12 = sshll.u32 %s1683_s11, 4  ;;  %s1684_s13 = smov 32   ;;  %s27_s12 = int_to_ptr.vmem [resolvable:$true] %s26_s12 }
   0xe   :  { %s1685_s6 = smov 2   ;;  %s48_s16 = sshll.u32 %s2280_s2, 4  ;;  %s49_s16 = int_to_ptr.hbm [resolvable:$true] %s48_s16 }
   0xf   :  { %32 = dma.hbm_to_vmem [thread:$0]  %s25_s29, 128, %s27_s12, [#allocation3], %s1684_s13, %s1684_s13, %s1685_s6  }
  0x10   :  { %s1686_s17 = smov [#allocation7]   ;;  %s1687_s18 = smov 512  }
  0x11   :  { %s50_s0 = sshll.u32 %s1686_s17, 4  ;;  %s72_s21 = sshll.u32 %s2282_s4, 4  ;;  %s51_s0 = int_to_ptr.vmem [resolvable:$true] %s50_s0  ;;  %s73_s21 = int_to_ptr.hbm [resolvable:$true] %s72_s21 }
  0x12   :  { %56 = dma.hbm_to_vmem [thread:$0]  %s49_s16, 8192, %s51_s0, [#allocation6], %s1687_s18, %s1687_s18, %s1684_s13  }
  0x13   :  { %s1688_s22 = smov [#allocation10]   ;;  %s102_s1 = sshll.u32 %s2286_s8, 4  ;;  %s103_s1 = int_to_ptr.hbm [resolvable:$true] %s102_s1 }
  0x14   :  { %s74_s23 = sshll.u32 %s1688_s22, 4  ;;  %s1689_s2 = smov [#allocation13]   ;;  %s75_s23 = int_to_ptr.vmem [resolvable:$true] %s74_s23 }
  0x15   :  { %80 = dma.hbm_to_vmem [thread:$0]  %s73_s21, 2048, %s75_s23, [#allocation9], %s1681_s30, %s1681_s30, %s1682_s3  }
  0x16   :  { %s104_s26 = sshll.u32 %s1689_s2, 4  ;;  %s105_s26 = int_to_ptr.vmem [resolvable:$true] %s104_s26 }
  0x17   :  { %110 = dma.hbm_to_vmem [thread:$0]  %s103_s1, 2048, %s105_s26, [#allocation12], %s1681_s30, %s1681_s30, %s1682_s3  }
  0x18   :  { %1668 = dma.done.wait [#allocation3], 128  }
  0x19   :  { %1669 = vsyncadd [#allocation3], 4294967168 }
  0x1a   :  { %1670 = dma.done.wait [#allocation6], 8448  }
  0x1b   :  { %1671 = vsyncadd [#allocation6], 4294958848 }
  0x1c   :  { %1672 = dma.done.wait [#allocation9], 2112  }
  0x1d   :  { %1673 = vsyncadd [#allocation9], 4294965184 }
  0x1e   :  { %1674 = dma.done.wait [#allocation12], 4096  }
  0x1f   :  { %1675 = vsyncadd [#allocation12], 4294963200  ;;  %v141_v0 = vld [vmem:[#allocation5] sm:$0xff]  ;;  %v142_v1 = vld [vmem:[#allocation5 + $0x8] sm:$0xff]  ;;  %vm282_vm0 = vcmask 1043456   ;;  %vm278_vm1 = vcmask 31744  }
  0x20   :  { %271 = vst [vmem:[#allocation1] ss:$2 sm:$0xff] %v141_v0  ;;  %v259_v2 = vld [vmem:[#allocation2] sm:$0x3]  ;;  %v1781_v7 = vld [vmem:[#allocation2 + $0x2] sm:$0x3] }
  0x21   :  { %273 = vst [vmem:[#allocation1 + $0x10] ss:$2 sm:$0xff] %v142_v1  ;;  %v1794_v12 = vld [vmem:[#allocation2 + $0x4] sm:$0x3]  ;;  %v1807_v17 = vld [vmem:[#allocation7 + $0x1e0] sm:$0xff]  ;;  %v1813_v21 = vld [vmem:[#allocation7 + $0x1f0] sm:$0xff] }
  0x22   :  { %v1809_v18 = vld [vmem:[#allocation7 + $0x1e8] sm:$0xff]  ;;  %v1815_v22 = vld [vmem:[#allocation7 + $0x1c0] sm:$0xff]  ;;  %v1823_v25 = vld [vmem:[#allocation7 + $0x1d0] sm:$0xff]  ;;  %s1691_s30 = smov [#allocation14]   ;;  %s1338_s13 = sshll.u32 %s2288_s10, 4  ;;  %s1339_s13 = int_to_ptr.hbm [resolvable:$true] %s1338_s13 }
  0x23   :  { %v1819_v24 = vld [vmem:[#allocation7 + $0x1c8] sm:$0xff]  ;;  %v1825_v26 = vld [vmem:[#allocation7 + $0x1a0] sm:$0xff]  ;;  %v1834_v29 = vld [vmem:[#allocation7 + $0x1b0] sm:$0xff]  ;;  %s1336_s3 = sshll.u32 %s1691_s30, 4  ;;  %s1337_s3 = int_to_ptr.vmem [resolvable:$true] %s1336_s3 }
  0x24   :  { %v1829_v27 = vld [vmem:[#allocation7 + $0x1a8] sm:$0xff]  ;;  %v1836_v30 = vld [vmem:[#allocation7 + $0x180] sm:$0xff]  ;;  %v1844_v32 = vld [vmem:[#allocation7 + $0x190] sm:$0xff] }
  0x25   :  { %2317 = vst [vmem:[#allocation20_spill] sm:$0xff] %v1829_v27  ;;  %v1831_v28 = vld [vmem:[#allocation2 + $0x6] sm:$0x3]  ;;  %v1850_v33 = vld [vmem:[#allocation7 + $0x160] sm:$0xff]  ;;  %v1855_v35 = vld [vmem:[#allocation7 + $0x170] sm:$0xff] }
  0x26   :  { %v1841_v31 = vld [vmem:[#allocation7 + $0x188] sm:$0xff]  ;;  %v1862_v37 = vld [vmem:[#allocation7 + $0x140] sm:$0xff]  ;;  %v1868_v39 = vld [vmem:[#allocation7 + $0x150] sm:$0xff] }
  0x27   :  { %v274_v3 = vld.sshfl [vmem:[#allocation1] sm:$0xff pattern:$0x75316420]  ;;  %v275_v4 = vld.sshfl [vmem:[#allocation1 + $0x8] sm:$0xff pattern:$0x75316420] }
  0x28   :  { %1351 = vmatpush.msk.msra.mxu3 %vm282_vm0, %v274_v3  ;;  %373 = vst [vmem:[#allocation1] ss:$2 sm:$0xff] %v141_v0  ;;  %v276_v5 = vld.sshfl [vmem:[#allocation1 + $0x10] sm:$0xff pattern:$0x75316420]  ;;  %v1852_v34 = vld [vmem:[#allocation7 + $0x168] sm:$0xff] }
  0x29   :  { %1352 = vmatmul.msk.f32.vlgmr.msra.gmra.mxu3 %vm278_vm1, %v259_v2  ;;  %v277_v6 = vld.sshfl [vmem:[#allocation1 + $0x18] sm:$0xff pattern:$0x75316420]  ;;  %v1864_v38 = vld [vmem:[#allocation7 + $0x148] sm:$0xff]  ;;  %v1871_v40 = vld [vmem:[#allocation7 + $0x120] sm:$0xff] }
  0x2a   :  { %1353 = vmatpush.msk.msrb.mxu3 %vm282_vm0, %v275_v4  ;;  %375 = vst [vmem:[#allocation1 + $0x10] ss:$2 sm:$0xff] %v142_v1  ;;  %v1873_v41 = vld [vmem:[#allocation7 + $0x128] sm:$0xff]  ;;  %v1878_v42 = vld [vmem:[#allocation7 + $0x130] sm:$0xff]  ;;  %v1881_v43 = vld [vmem:[#allocation7 + $0x100] sm:$0xff] }
  0x2b   :  { %v1883_v44 = vld [vmem:[#allocation7 + $0x108] sm:$0xff]  ;;  %v1889_v45 = vld [vmem:[#allocation7 + $0x110] sm:$0xff]  ;;  %v1892_v46 = vld [vmem:[#allocation7 + $0xe0] sm:$0xff] }
  0x2c   :  { %1355 = vmatpush.msk.msra.mxu3 %vm282_vm0, %v276_v5  ;;  %v1894_v47 = vld [vmem:[#allocation7 + $0xe8] sm:$0xff]  ;;  %v1898_v48 = vld [vmem:[#allocation7 + $0xf0] sm:$0xff]  ;;  %v1900_v49 = vld [vmem:[#allocation7 + $0x1f8] sm:$0xff] }
  0x2d   :  { %v1905_v50 = vld [vmem:[#allocation7 + $0xc0] sm:$0xff]  ;;  %v1907_v51 = vld [vmem:[#allocation7 + $0xc8] sm:$0xff]  ;;  %v1911_v52 = vld [vmem:[#allocation7 + $0xd0] sm:$0xff] }
  0x2e   :  { %2318 = vst [vmem:[#allocation21_spill] sm:$0xff] %v1911_v52  ;;  %v1913_v53 = vld [vmem:[#allocation7 + $0x1d8] sm:$0xff]  ;;  %v1917_v54 = vld [vmem:[#allocation7 + $0xa0] sm:$0xff]  ;;  %v1919_v55 = vld [vmem:[#allocation7 + $0xa8] sm:$0xff] }
  0x2f   :  { %v376_v8 = vld.sshfl [vmem:[#allocation1] sm:$0xff pattern:$0x75316420]  ;;  %v377_v9 = vld.sshfl [vmem:[#allocation1 + $0x8] sm:$0xff pattern:$0x75316420] }
  0x30   :  { %1359 = vmatpush.msk.msra.mxu0 %vm282_vm0, %v376_v8  ;;  %1361 = vmatpush.msk.msra.mxu1 %vm282_vm0, %v377_v9  ;;  %473 = vst [vmem:[#allocation1] ss:$2 sm:$0xff] %v141_v0  ;;  %v1923_v56 = vld [vmem:[#allocation7 + $0xb0] sm:$0xff]  ;;  %v1925_v57 = vld [vmem:[#allocation7 + $0x1b8] sm:$0xff]  ;;  %v1929_v58 = vld [vmem:[#allocation7 + $0x80] sm:$0xff] }
  0x31   :  { %1354 = vmatmul.msk.f32.vlgmr.msrb.gmra.mxu3 %vm278_vm1, %v259_v2  ;;  %v378_v10 = vld.sshfl [vmem:[#allocation1 + $0x10] sm:$0xff pattern:$0x75316420]  ;;  %v379_v11 = vld.sshfl [vmem:[#allocation1 + $0x18] sm:$0xff pattern:$0x75316420]  ;;  %1360 = vmatmul.msk.f32.vlgmr.msra.gmra.mxu0 %vm278_vm1, %v1781_v7 }
  0x32   :  { %1363 = vmatpush.msk.msra.mxu2 %vm282_vm0, %v378_v10  ;;  %475 = vst [vmem:[#allocation1 + $0x10] ss:$2 sm:$0xff] %v142_v1  ;;  %1357 = vmatpush.msk.msrb.mxu3 %vm282_vm0, %v277_v6  ;;  %v1931_v59 = vld [vmem:[#allocation7 + $0x88] sm:$0xff]  ;;  %v1935_v60 = vld [vmem:[#allocation7 + $0x90] sm:$0xff]  ;;  %v1937_v61 = vld [vmem:[#allocation7 + $0x198] sm:$0xff] }
  0x33   :  { %1362 = vmatmul.msk.f32.vlgmr.msra.gmra.mxu1 %vm278_vm1, %v1781_v7  ;;  %1364 = vmatmul.msk.f32.vlgmr.msra.gmra.mxu2 %vm278_vm1, %v1781_v7  ;;  %2319 = vst [vmem:[#allocation22_spill] sm:$0xff] %v1917_v54  ;;  %v1941_v62 = vld [vmem:[#allocation7 + $0x60] sm:$0xff]  ;;  %v1943_v63 = vld [vmem:[#allocation7 + $0x68] sm:$0xff]  ;;  %v1959_v4 = vld [vmem:[#allocation7 + $0x50] sm:$0xff] }
  0x34   :  { %2320 = vst [vmem:[#allocation23_spill] sm:$0xff] %v1919_v55  ;;  %v1955_v3 = vld [vmem:[#allocation7 + $0x48] sm:$0xff]  ;;  %v1961_v5 = vld [vmem:[#allocation7 + $0x158] sm:$0xff]  ;;  %v1965_v6 = vld [vmem:[#allocation7 + $0x20] sm:$0xff] }
  0x35   :  { %2321 = vst [vmem:[#allocation24_spill] sm:$0xff] %v1923_v56  ;;  %v1971_v8 = vld [vmem:[#allocation7 + $0x30] sm:$0xff]  ;;  %v1973_v9 = vld [vmem:[#allocation7 + $0x138] sm:$0xff]  ;;  %v1977_v10 = vld [vmem:[#allocation7] sm:$0xff] }
  0x36   :  { %2322 = vst [vmem:[#allocation25_spill] sm:$0xff] %v1929_v58 }
  0x37   :  { %v476_v13 = vld.sshfl [vmem:[#allocation1] sm:$0xff pattern:$0x75316420]  ;;  %v477_v14 = vld.sshfl [vmem:[#allocation1 + $0x8] sm:$0xff pattern:$0x75316420] }
  0x38   :  { %1367 = vmatpush.msk.msrb.mxu0 %vm282_vm0, %v476_v13  ;;  %1369 = vmatpush.msk.msrb.mxu1 %vm282_vm0, %v477_v14  ;;  %573 = vst [vmem:[#allocation1] ss:$2 sm:$0xff] %v141_v0  ;;  %v1947_v0 = vld [vmem:[#allocation7 + $0x70] sm:$0xff]  ;;  %v1985_v13 = vld [vmem:[#allocation7 + $0x118] sm:$0xff] }
  0x39   :  { %1356 = vmatmul.msk.f32.vlgmr.msra.gmra.mxu3 %vm278_vm1, %v259_v2  ;;  %v478_v15 = vld.sshfl [vmem:[#allocation1 + $0x10] sm:$0xff pattern:$0x75316420]  ;;  %v479_v16 = vld.sshfl [vmem:[#allocation1 + $0x18] sm:$0xff pattern:$0x75316420]  ;;  %1368 = vmatmul.msk.f32.vlgmr.msrb.gmra.mxu0 %vm278_vm1, %v1794_v12 }
  0x3a   :  { %1371 = vmatpush.msk.msrb.mxu2 %vm282_vm0, %v478_v15  ;;  %575 = vst [vmem:[#allocation1 + $0x10] ss:$2 sm:$0xff] %v142_v1  ;;  %1365 = vmatpush.msk.msra.mxu3 %vm282_vm0, %v379_v11  ;;  %v1949_v1 = vld [vmem:[#allocation7 + $0x178] sm:$0xff]  ;;  %v1979_v11 = vld [vmem:[#allocation7 + $0x8] sm:$0xff]  ;;  %v1690_v15 = vmov 0.0  }
  0x3b   :  { %1370 = vmatmul.msk.f32.vlgmr.msrb.gmra.mxu1 %vm278_vm1, %v1794_v12  ;;  %1372 = vmatmul.msk.f32.vlgmr.msrb.gmra.mxu2 %vm278_vm1, %v1794_v12  ;;  %2323 = vst [vmem:[#allocation26_spill] sm:$0xff] %v1931_v59  ;;  %v1991_v14 = vld [vmem:[#allocation7 + $0xf8] sm:$0xff] }
  0x3c   :  { %2324 = vst [vmem:[#allocation27_spill] sm:$0xff] %v1935_v60 }
  0x3d   :  { %2325 = vst [vmem:[#allocation28_spill] sm:$0xff] %v1941_v62 }
  0x3e   :  { %2326 = vst [vmem:[#allocation29_spill] sm:$0xff] %v1943_v63 }
  0x3f   :  { %v576_v19 = vld.sshfl [vmem:[#allocation1] sm:$0xff pattern:$0x75316420]  ;;  %v577_v20 = vld.sshfl [vmem:[#allocation1 + $0x8] sm:$0xff pattern:$0x75316420] }
  0x40   :  { %1375 = vmatpush.msk.msra.mxu0 %vm282_vm0, %v576_v19  ;;  %1377 = vmatpush.msk.msra.mxu1 %vm282_vm0, %v577_v20  ;;  %2327 = vst [vmem:[#allocation30_spill] sm:$0xff] %v1947_v0  ;;  %v1998_v19 = vld [vmem:[#allocation7 + $0xb8] sm:$0xff] }
  0x41   :  { %v578_v23 = vld.sshfl [vmem:[#allocation1 + $0x10] sm:$0xff pattern:$0x75316420]  ;;  %1358 = vmatmul.msk.f32.vlgmr.msrb.gmra.mxu3 %vm278_vm1, %v259_v2  ;;  %1376 = vmatmul.msk.f32.vlgmr.msra.gmra.mxu0 %vm278_vm1, %v1831_v28  ;;  %v579_v36 = vld.sshfl [vmem:[#allocation1 + $0x18] sm:$0xff pattern:$0x75316420] }
  0x42   :  { %671 = vmatpush.msrb.mxu0 %v1807_v17  ;;  %1379 = vmatpush.msk.msra.mxu2 %vm282_vm0, %v578_v23  ;;  %v1953_v2 = vld [vmem:[#allocation7 + $0x40] sm:$0xff]  ;;  %2329 = vst [vmem:[#allocation32_spill] sm:$0xff] %v1955_v3  ;;  %v2005_v20 = vld [vmem:[#allocation7 + $0x98] sm:$0xff] }
  0x43   :  { %691 = vmatpush.msrb.mxu1 %v1809_v18  ;;  %1373 = vmatpush.msk.msrb.mxu3 %vm282_vm0, %v479_v16  ;;  %2328 = vst [vmem:[#allocation31_spill] sm:$0xff] %v1953_v2  ;;  %v1995_v16 = vld [vmem:[#allocation7 + $0xd8] sm:$0xff] }
  0x44   :  { %711 = vmatpush.msrb.mxu2 %v1813_v21  ;;  %672 = vmatpush.msrb.mxu0 %v1815_v22  ;;  %2330 = vst [vmem:[#allocation33_spill] sm:$0xff] %v1959_v4  ;;  %v2011_v23 = vld [vmem:[#allocation7 + $0x78] sm:$0xff] }
  0x45   :  { %692 = vmatpush.msrb.mxu1 %v1819_v24  ;;  %1380 = vmatmul.msk.f32.vlgmr.msra.gmra.mxu2 %vm278_vm1, %v1831_v28  ;;  %2331 = vst [vmem:[#allocation34_spill] sm:$0xff] %v1965_v6 }
  0x46   :  { %712 = vmatpush.msrb.mxu2 %v1823_v25  ;;  %673 = vmatpush.msrb.mxu0 %v1825_v26  ;;  %2333 = vst [vmem:[#allocation36_spill] sm:$0xff] %v1971_v8 }
  0x47   :  { %693 = vmatpush.msrb.mxu1 %v1829_v27  ;;  %2334 = vst [vmem:[#allocation37_spill] sm:$0xff] %v1977_v10 }
  0x48   :  { %713 = vmatpush.msrb.mxu2 %v1834_v29  ;;  %674 = vmatpush.msrb.mxu0 %v1836_v30  ;;  %2335 = vst [vmem:[#allocation38_spill] sm:$0xff] %v1979_v11 }
  0x49   :  { %694 = vmatpush.msrb.mxu1 %v1841_v31  ;;  %1366 = vmatmul.msk.f32.vlgmr.msra.gmra.mxu3 %vm278_vm1, %v1781_v7  ;;  %v1967_v7 = vld [vmem:[#allocation7 + $0x28] sm:$0xff]  ;;  %2337 = vst [vmem:[#allocation40_spill] sm:$0xff] %v1995_v16 }
  0x4a   :  { %714 = vmatpush.msrb.mxu2 %v1844_v32  ;;  %675 = vmatpush.msrb.mxu0 %v1850_v33  ;;  %2332 = vst [vmem:[#allocation35_spill] sm:$0xff] %v1967_v7 }
  0x4b   :  { %695 = vmatpush.msrb.mxu1 %v1852_v34  ;;  %1381 = vmatpush.msk.msra.mxu3 %vm282_vm0, %v579_v36  ;;  %2338 = vst [vmem:[#allocation41_spill] sm:$0xff] %v1998_v19  ;;  %v2023_v36 = vld [vmem:[#allocation7 + $0x38] sm:$0xff] }
  0x4c   :  { %715 = vmatpush.msrb.mxu2 %v1855_v35  ;;  %676 = vmatpush.msrb.mxu0 %v1862_v37  ;;  %2339 = vst [vmem:[#allocation42_spill] sm:$0xff] %v2005_v20 }
  0x4d   :  { %696 = vmatpush.msrb.mxu1 %v1864_v38  ;;  %2340 = vst [vmem:[#allocation43_spill] sm:$0xff] %v2011_v23 }
  0x4e   :  { %716 = vmatpush.msrb.mxu2 %v1868_v39  ;;  %1378 = vmatmul.msk.f32.vlgmr.msra.gmra.mxu1 %vm278_vm1, %v1831_v28  ;;  %2342 = vst [vmem:[#allocation45_spill] sm:$0xff] %v2023_v36 }
  0x4f   :  { %677 = vmatpush.msrb.mxu0 %v1871_v40  ;;  %697 = vmatpush.msrb.mxu1 %v1873_v41 }
  0x50   :  { %717 = vmatpush.msrb.mxu2 %v1878_v42 }
  0x51   :  { %678 = vmatpush.msrb.mxu0 %v1881_v43  ;;  %698 = vmatpush.msrb.mxu1 %v1883_v44 }
  0x52   :  { %718 = vmatpush.msrb.mxu2 %v1889_v45  ;;  %1374 = vmatmul.msk.f32.vlgmr.msrb.gmra.mxu3 %vm278_vm1, %v1794_v12  ;;  %v1983_v12 = vld [vmem:[#allocation7 + $0x10] sm:$0xff] }
  0x53   :  { %679 = vmatpush.msrb.mxu0 %v1892_v46  ;;  %699 = vmatpush.msrb.mxu1 %v1894_v47  ;;  %2336 = vst [vmem:[#allocation39_spill] sm:$0xff] %v1983_v12 }
  0x54   :  { %719 = vmatpush.msrb.mxu2 %v1898_v48  ;;  %731 = vmatpush.msrb.mxu3 %v1900_v49 }
  0x55   :  { %680 = vmatpush.msrb.mxu0 %v1905_v50  ;;  %700 = vmatpush.msrb.mxu1 %v1907_v51 }
  0x56   :  { %720 = vmatpush.msrb.mxu2 %v1911_v52  ;;  %732 = vmatpush.msrb.mxu3 %v1913_v53 }
  0x57   :  { %681 = vmatpush.msrb.mxu0 %v1917_v54  ;;  %701 = vmatpush.msrb.mxu1 %v1919_v55 }
  0x58   :  { %721 = vmatpush.msrb.mxu2 %v1923_v56  ;;  %733 = vmatpush.msrb.mxu3 %v1925_v57 }
  0x59   :  { %682 = vmatpush.msrb.mxu0 %v1929_v58  ;;  %702 = vmatpush.msrb.mxu1 %v1931_v59 }
  0x5a   :  { %722 = vmatpush.msrb.mxu2 %v1935_v60  ;;  %734 = vmatpush.msrb.mxu3 %v1937_v61 }
  0x5b   :  { %683 = vmatpush.msrb.mxu0 %v1941_v62  ;;  %703 = vmatpush.msrb.mxu1 %v1943_v63 }
  0x5c   :  { %723 = vmatpush.msrb.mxu2 %v1947_v0  ;;  %735 = vmatpush.msrb.mxu3 %v1949_v1 }
  0x5d   :  { %684 = vmatpush.msrb.mxu0 %v1953_v2  ;;  %704 = vmatpush.msrb.mxu1 %v1955_v3 }
  0x5e   :  { %724 = vmatpush.msrb.mxu2 %v1959_v4  ;;  %736 = vmatpush.msrb.mxu3 %v1961_v5 }
  0x5f   :  { %685 = vmatpush.msrb.mxu0 %v1965_v6  ;;  %705 = vmatpush.msrb.mxu1 %v1967_v7 }
  0x60   :  { %725 = vmatpush.msrb.mxu2 %v1971_v8  ;;  %737 = vmatpush.msrb.mxu3 %v1973_v9 }
  0x61   :  { %686 = vmatpush.msrb.mxu0 %v1977_v10  ;;  %706 = vmatpush.msrb.mxu1 %v1979_v11 }
  0x62   :  { %726 = vmatpush.msrb.mxu2 %v1983_v12  ;;  %738 = vmatpush.msrb.mxu3 %v1985_v13 }
  0x63   :  { %687 = vmatmul.f32.vlgmr.msrb.gmra.mxu0 %v1690_v15  ;;  %707 = vmatmul.f32.vlgmr.msrb.gmra.mxu1 %v1690_v15 }
  0x64   :  { %727 = vmatmul.f32.vlgmr.msrb.gmra.mxu2 %v1690_v15  ;;  %739 = vmatpush.msrb.mxu3 %v1991_v14 }
  0x65   :  { %1382 = vmatmul.msk.f32.vlgmr.msra.gmra.mxu3 %vm278_vm1, %v1831_v28  ;;  %818 = vmatpush.msra.mxu0 %v1807_v17  ;;  %v2017_v28 = vld [vmem:[#allocation7 + $0x58] sm:$0xff] }
  0x66   :  { %740 = vmatpush.msrb.mxu3 %v1995_v16  ;;  %838 = vmatpush.msra.mxu1 %v1809_v18  ;;  %2341 = vst [vmem:[#allocation44_spill] sm:$0xff] %v2017_v28 }
  0x67   :  { %858 = vmatpush.msra.mxu2 %v1813_v21  ;;  %819 = vmatpush.msra.mxu0 %v1815_v22 }
  0x68   :  { %741 = vmatpush.msrb.mxu3 %v1998_v19  ;;  %839 = vmatpush.msra.mxu1 %v1819_v24 }
  0x69   :  { %859 = vmatpush.msra.mxu2 %v1823_v25  ;;  %820 = vmatpush.msra.mxu0 %v1825_v26 }
  0x6a   :  { %742 = vmatpush.msrb.mxu3 %v2005_v20  ;;  %840 = vmatpush.msra.mxu1 %v1829_v27  ;;  %v2029_v27 = vld [vmem:[#allocation7 + $0x18] sm:$0xff] }
  0x6b   :  { %860 = vmatpush.msra.mxu2 %v1834_v29  ;;  %821 = vmatpush.msra.mxu0 %v1836_v30  ;;  %2343 = vst [vmem:[#allocation46_spill] sm:$0xff] %v2029_v27 }
  0x6c   :  { %743 = vmatpush.msrb.mxu3 %v2011_v23  ;;  %841 = vmatpush.msra.mxu1 %v1841_v31 }
  0x6d   :  { %861 = vmatpush.msra.mxu2 %v1844_v32  ;;  %822 = vmatpush.msra.mxu0 %v1850_v33 }
  0x6e   :  { %744 = vmatpush.msrb.mxu3 %v2017_v28  ;;  %842 = vmatpush.msra.mxu1 %v1852_v34 }
  0x6f   :  { %862 = vmatpush.msra.mxu2 %v1855_v35  ;;  %823 = vmatpush.msra.mxu0 %v1862_v37 }
  0x70   :  { %745 = vmatpush.msrb.mxu3 %v2023_v36  ;;  %843 = vmatpush.msra.mxu1 %v1864_v38 }
  0x71   :  { %863 = vmatpush.msra.mxu2 %v1868_v39  ;;  %824 = vmatpush.msra.mxu0 %v1871_v40 }
  0x72   :  { %746 = vmatpush.msrb.mxu3 %v2029_v27  ;;  %844 = vmatpush.msra.mxu1 %v1873_v41 }
  0x73   :  { %747 = vmatmul.f32.vlgmr.msrb.gmra.mxu3 %v1690_v15  ;;  %864 = vmatpush.msra.mxu2 %v1878_v42  ;;  %v2344_v15 = vld [vmem:[#allocation20_spill] sm:$0xff] }
  0x74   :  { %878 = vmatpush.msra.mxu3 %v1900_v49  ;;  %825 = vmatpush.msra.mxu0 %v1881_v43 }
  0x75   :  { %845 = vmatpush.msra.mxu1 %v1883_v44  ;;  %865 = vmatpush.msra.mxu2 %v1889_v45 }
  0x76   :  { %879 = vmatpush.msra.mxu3 %v1913_v53  ;;  %826 = vmatpush.msra.mxu0 %v1892_v46 }
  0x77   :  { %846 = vmatpush.msra.mxu1 %v1894_v47  ;;  %866 = vmatpush.msra.mxu2 %v1898_v48 }
  0x78   :  { %880 = vmatpush.msra.mxu3 %v1925_v57  ;;  %827 = vmatpush.msra.mxu0 %v1905_v50 }
  0x79   :  { %847 = vmatpush.msra.mxu1 %v1907_v51  ;;  %867 = vmatpush.msra.mxu2 %v1911_v52 }
  0x7a   :  { %881 = vmatpush.msra.mxu3 %v1937_v61  ;;  %828 = vmatpush.msra.mxu0 %v1917_v54 }
  0x7b   :  { %848 = vmatpush.msra.mxu1 %v1919_v55  ;;  %868 = vmatpush.msra.mxu2 %v1923_v56 }
  0x7c   :  { %882 = vmatpush.msra.mxu3 %v1949_v1  ;;  %829 = vmatpush.msra.mxu0 %v1929_v58 }
  0x7d   :  { %849 = vmatpush.msra.mxu1 %v1931_v59  ;;  %869 = vmatpush.msra.mxu2 %v1935_v60 }
  0x7e   :  { %883 = vmatpush.msra.mxu3 %v1961_v5  ;;  %830 = vmatpush.msra.mxu0 %v1941_v62 }
  0x7f   :  { %850 = vmatpush.msra.mxu1 %v1943_v63  ;;  %870 = vmatpush.msra.mxu2 %v1947_v0 }
  0x80   :  { %884 = vmatpush.msra.mxu3 %v1973_v9  ;;  %831 = vmatpush.msra.mxu0 %v1953_v2 }
  0x81   :  { %851 = vmatpush.msra.mxu1 %v1955_v3  ;;  %871 = vmatpush.msra.mxu2 %v1959_v4 }
  0x82   :  { %885 = vmatpush.msra.mxu3 %v1985_v13  ;;  %832 = vmatpush.msra.mxu0 %v1965_v6 }
  0x83   :  { %852 = vmatpush.msra.mxu1 %v1967_v7  ;;  %872 = vmatpush.msra.mxu2 %v1971_v8 }
  0x84   :  { %886 = vmatpush.msra.mxu3 %v1991_v14  ;;  %833 = vmatpush.msra.mxu0 %v1977_v10 }
  0x85   :  { %853 = vmatpush.msra.mxu1 %v1979_v11  ;;  %873 = vmatpush.msra.mxu2 %v1983_v12 }
  0x86   :  { %887 = vmatpush.msra.mxu3 %v1995_v16  ;;  %965 = vmatpush.msrb.mxu0 %v1807_v17 }
  0x87   :  { %985 = vmatpush.msrb.mxu1 %v1809_v18  ;;  %1005 = vmatpush.msrb.mxu2 %v1813_v21 }
  0x88   :  { %888 = vmatpush.msra.mxu3 %v1998_v19  ;;  %966 = vmatpush.msrb.mxu0 %v1815_v22 }
  0x89   :  { %986 = vmatpush.msrb.mxu1 %v1819_v24  ;;  %1006 = vmatpush.msrb.mxu2 %v1823_v25 }
  0x8a   :  { %889 = vmatpush.msra.mxu3 %v2005_v20  ;;  %967 = vmatpush.msrb.mxu0 %v1825_v26 }
  0x8b   :  { %987 = vmatpush.msrb.mxu1 %v2344_v15  ;;  %1007 = vmatpush.msrb.mxu2 %v1834_v29 }
  0x8c   :  { %890 = vmatpush.msra.mxu3 %v2011_v23  ;;  %968 = vmatpush.msrb.mxu0 %v1836_v30 }
  0x8d   :  { %988 = vmatpush.msrb.mxu1 %v1841_v31  ;;  %1008 = vmatpush.msrb.mxu2 %v1844_v32 }
  0x8e   :  { %891 = vmatpush.msra.mxu3 %v2017_v28  ;;  %969 = vmatpush.msrb.mxu0 %v1850_v33 }
  0x8f   :  { %989 = vmatpush.msrb.mxu1 %v1852_v34  ;;  %1009 = vmatpush.msrb.mxu2 %v1855_v35 }
  0x90   :  { %892 = vmatpush.msra.mxu3 %v2023_v36  ;;  %970 = vmatpush.msrb.mxu0 %v1862_v37 }
  0x91   :  { %990 = vmatpush.msrb.mxu1 %v1864_v38  ;;  %1010 = vmatpush.msrb.mxu2 %v1868_v39 }
  0x92   :  { %893 = vmatpush.msra.mxu3 %v2029_v27  ;;  %971 = vmatpush.msrb.mxu0 %v1871_v40 }
  0x93   :  { %991 = vmatpush.msrb.mxu1 %v1873_v41  ;;  %1011 = vmatpush.msrb.mxu2 %v1878_v42 }
  0x94   :  { %1025 = vmatpush.msrb.mxu3 %v1900_v49  ;;  %972 = vmatpush.msrb.mxu0 %v1881_v43 }
  0x95   :  { %992 = vmatpush.msrb.mxu1 %v1883_v44  ;;  %1012 = vmatpush.msrb.mxu2 %v1889_v45 }
  0x96   :  { %1026 = vmatpush.msrb.mxu3 %v1913_v53  ;;  %973 = vmatpush.msrb.mxu0 %v1892_v46 }
  0x97   :  { %993 = vmatpush.msrb.mxu1 %v1894_v47  ;;  %1013 = vmatpush.msrb.mxu2 %v1898_v48 }
  0x98   :  { %1027 = vmatpush.msrb.mxu3 %v1925_v57  ;;  %974 = vmatpush.msrb.mxu0 %v1905_v50 }
  0x99   :  { %994 = vmatpush.msrb.mxu1 %v1907_v51  ;;  %1014 = vmatpush.msrb.mxu2 %v1911_v52 }
  0x9a   :  { %1028 = vmatpush.msrb.mxu3 %v1937_v61  ;;  %975 = vmatpush.msrb.mxu0 %v1917_v54 }
  0x9b   :  { %995 = vmatpush.msrb.mxu1 %v1919_v55  ;;  %1015 = vmatpush.msrb.mxu2 %v1923_v56 }
  0x9c   :  { %1029 = vmatpush.msrb.mxu3 %v1949_v1  ;;  %976 = vmatpush.msrb.mxu0 %v1929_v58 }
  0x9d   :  { %996 = vmatpush.msrb.mxu1 %v1931_v59  ;;  %1016 = vmatpush.msrb.mxu2 %v1935_v60 }
  0x9e   :  { %1030 = vmatpush.msrb.mxu3 %v1961_v5  ;;  %977 = vmatpush.msrb.mxu0 %v1941_v62 }
  0x9f   :  { %997 = vmatpush.msrb.mxu1 %v1943_v63  ;;  %1017 = vmatpush.msrb.mxu2 %v1947_v0 }
  0xa0   :  { %1031 = vmatpush.msrb.mxu3 %v1973_v9  ;;  %978 = vmatpush.msrb.mxu0 %v1953_v2 }
  0xa1   :  { %998 = vmatpush.msrb.mxu1 %v1955_v3  ;;  %1018 = vmatpush.msrb.mxu2 %v1959_v4  ;;  %v207_v4 = vld [vmem:[#allocation8] sm:$0xf] }
  0xa2   :  { %1032 = vmatpush.msrb.mxu3 %v1985_v13  ;;  %979 = vmatpush.msrb.mxu0 %v1965_v6  ;;  %v263_v0 = vperm.slane %v207_v4, 2 }
  0xa3   :  { %999 = vmatpush.msrb.mxu1 %v1967_v7  ;;  %1019 = vmatpush.msrb.mxu2 %v1971_v8  ;;  %v261_v7 = vperm.slane %v207_v4, 0 }
  0xa4   :  { %1033 = vmatpush.msrb.mxu3 %v1991_v14  ;;  %980 = vmatpush.msrb.mxu0 %v1977_v10  ;;  %v262_v10 = vperm.slane %v207_v4, 1 }
  0xa5   :  { %1000 = vmatpush.msrb.mxu1 %v1979_v11  ;;  %1020 = vmatpush.msrb.mxu2 %v1983_v12 }
  0xa6   :  { %1034 = vmatpush.msrb.mxu3 %v1995_v16 }
  0xa8   :  { %1035 = vmatpush.msrb.mxu3 %v1998_v19 }
  0xaa   :  { %1036 = vmatpush.msrb.mxu3 %v2005_v20 }
  0xac   :  { %1037 = vmatpush.msrb.mxu3 %v2011_v23  ;;  %v308_v6 = vpop.f32.mrf.mxu3 }
  0xae   :  { %1038 = vmatpush.msrb.mxu3 %v2017_v28  ;;  %v408_v8 = vpop.f32.mrf.mxu0 }
  0xaf   :  { %v2146_v3 = vadd.f32 %v408_v8, %v261_v7 }
  0xb0   :  { %1039 = vmatpush.msrb.mxu3 %v2023_v36  ;;  %v428_v11 = vpop.f32.mrf.mxu1 }
  0xb1   :  { %2345 = vst [vmem:[#allocation20_spill] sm:$0xff] %v2146_v3  ;;  %v2149_v12 = vadd.f32 %v428_v11, %v262_v10 }
  0xb2   :  { %1040 = vmatpush.msrb.mxu3 %v2029_v27 }
  0xb3   :  { %2346 = vst [vmem:[#allocation47_spill] sm:$0xff] %v2149_v12  ;;  %v264_v12 = vperm.slane %v207_v4, 3 }
  0xb4   :  { %v328_v2 = vpop.f32.mrf.mxu3 }
  0xb6   :  { %v508_v63 = vpop.f32.mrf.mxu0  ;;  %v448_v62 = vpop.f32.mrf.mxu2 }
  0xb7   :  { %v2151_v23 = vadd.f32 %v508_v63, %v261_v7  ;;  %v2153_v20 = vadd.f32 %v448_v62, %v263_v0 }
  0xb8   :  { %v528_v28 = vpop.f32.mrf.mxu1 }
  0xb9   :  { %2347 = vst [vmem:[#allocation48_spill] sm:$0xff] %v2151_v23  ;;  %v2155_v60 = vadd.f32 %v528_v28, %v262_v10 }
  0xba   :  { %2348 = vst [vmem:[#allocation49_spill] sm:$0xff] %v2153_v20  ;;  %v309_v20 = vadd.f32 %v308_v6, %v261_v7 }
  0xbb   :  { %2349 = vst [vmem:[#allocation50_spill] sm:$0xff] %v2155_v60 }
  0xbc   :  { %v348_v36 = vpop.f32.mrf.mxu3 }
  0xbd   :  { %v349_v4 = vadd.f32 %v348_v36, %v263_v0 }
  0xbe   :  { %v548_v59 = vpop.f32.mrf.mxu2  ;;  %v608_v3 = vpop.f32.mrf.mxu0 }
  0xbf   :  { %v2157_v8 = vadd.f32 %v548_v59, %v263_v0  ;;  %v2159_v27 = vadd.f32 %v608_v3, %v261_v7  ;;  %v329_v59 = vadd.f32 %v328_v2, %v262_v10 }
  0xc1   :  { %2350 = vst [vmem:[#allocation51_spill] sm:$0xff] %v2157_v8 }
  0xc2   :  { %2351 = vst [vmem:[#allocation52_spill] sm:$0xff] %v2159_v27 }
  0xc4   :  { %v368_v58 = vpop.f32.mrf.mxu3 }
  0xc8   :  { %v648_v56 = vpop.f32.mrf.mxu2 }
  0xc9   :  { %v2163_v23 = vadd.f32 %v648_v56, %v263_v0 }
  0xcb   :  { %v628_v11 = vpop.f32.mrf.mxu1  ;;  %2353 = vst [vmem:[#allocation54_spill] sm:$0xff] %v2163_v23 }
  0xcc   :  { %v2161_v19 = vadd.f32 %v628_v11, %v262_v10  ;;  %v468_v63 = vpop.f32.mrf.mxu3 }
  0xcd   :  { %v2165_v62 = vadd.f32 %v468_v63, %v264_v12 }
  0xce   :  { %2352 = vst [vmem:[#allocation53_spill] sm:$0xff] %v2161_v19 }
  0xcf   :  { %2354 = vst [vmem:[#allocation55_spill] sm:$0xff] %v2165_v62 }
  0xd5   :  { %v568_v28 = vpop.f32.mrf.mxu3 }
  0xd6   :  { %v2167_v60 = vadd.f32 %v568_v28, %v264_v12 }
  0xd8   :  { %2355 = vst [vmem:[#allocation56_spill] sm:$0xff] %v2167_v60 }
  0xe0   :  { %v688_v8 = vpop.f32.mrf.mxu0  ;;  %v708_v55 = vpop.f32.mrf.mxu1 }
  0xe1   :  { %v751_v54 = vadd.f32 %v688_v8, %v309_v20  ;;  %v752_v3 = vadd.f32 %v708_v55, %v329_v59 }
  0xe3   :  { %v1383_v27 = vmul.f32 -1.442695, %v751_v54  ;;  %v1384_v16 = vmul.f32 -1.442695, %v752_v3 }
  0xe5   :  { %1412 = vpow2.f32 %v1383_v27  ;;  %v369_v27 = vadd.f32 %v368_v58, %v264_v12 }
  0xe6   :  { %1414 = vpow2.f32 %v1384_v16 }
  0xe7   :  { %v728_v11 = vpop.f32.mrf.mxu2 }
  0xe8   :  { %v753_v19 = vadd.f32 %v728_v11, %v349_v4  ;;  %v668_v56 = vpop.f32.mrf.mxu3 }
  0xe9   :  { %v2169_v23 = vadd.f32 %v668_v56, %v264_v12 }
  0xea   :  { %v1385_v63 = vmul.f32 -1.442695, %v753_v19 }
  0xeb   :  { %2356 = vst [vmem:[#allocation57_spill] sm:$0xff] %v2169_v23  ;;  %v1413_v62 = vpop.eup %1412 }
  0xec   :  { %v1415_v28 = vpop.eup %1414  ;;  %v764_v60 = vadd.f32 1.0, %v1413_v62  ;;  %1416 = vpow2.f32 %v1385_v63 }
  0xed   :  { %v765_v2 = vadd.f32 1.0, %v1415_v28 }
  0xee   :  { %1418 = vrcp.f32 %v764_v60  ;;  %v776_v19 = vand.u32 2147483647, %v764_v60  ;;  %v778_v59 = vand.u32 2147483648, %v764_v60  ;;  %vm772_vm4 = vweird.f32 %v764_v60 }
  0xef   :  { %1420 = vrcp.f32 %v765_v2  ;;  %v793_v3 = vand.u32 2147483648, %v765_v2  ;;  %v791_v11 = vand.u32 2147483647, %v765_v2  ;;  %vm787_vm5 = vweird.f32 %v765_v2 }
  0xf0   :  { %v779_v12 = vor.u32 1.1754944e-38, %v778_v59  ;;  %vm777_vm7 = vcmp.eq.f32.partialorder %v776_v19, 8.507059e+37 }
  0xf1   :  { %vm792_vm9 = vcmp.eq.f32.partialorder %v791_v11, 8.507059e+37 }
  0xf2   :  { %v1417_v6 = vpop.eup %1416 }
  0xf3   :  { %v766_v55 = vadd.f32 1.0, %v1417_v6  ;;  %v794_v6 = vor.u32 1.1754944e-38, %v793_v3 }
  0xf4   :  { %v1419_v54 = vpop.eup %1418 }
  0xf5   :  { %v1421_v7 = vpop.eup %1420  ;;  %v768_v0 = vmul.f32 %v1419_v54, %v764_v60  ;;  %1422 = vrcp.f32 %v766_v55  ;;  %vm773_vm2 = vweird.f32 %v1419_v54  ;;  %vm802_vm11 = vweird.f32 %v766_v55 }
  0xf6   :  { %v783_v10 = vmul.f32 %v1421_v7, %v765_v2  ;;  %v748_v16 = vpop.f32.mrf.mxu3  ;;  %vm788_vm3 = vweird.f32 %v1421_v7  ;;  %vm774_vm6 = vmor %vm772_vm4, %vm773_vm2  ;;  %v808_v2 = vand.u32 2147483648, %v766_v55 }
  0xf7   :  { %v769_v20 = vsub.f32 1.0, %v768_v0  ;;  %v754_v36 = vadd.f32 %v748_v16, %v369_v27  ;;  %vm789_vm8 = vmor %vm787_vm5, %vm788_vm3 }
  0xf8   :  { %v784_v8 = vsub.f32 1.0, %v783_v10  ;;  %v809_v59 = vor.u32 1.1754944e-38, %v808_v2 }
  0xf9   :  { %v770_v62 = vmul.f32 %v1419_v54, %v769_v20  ;;  %1424 = vtanh.f32 %v754_v36 }
  0xfa   :  { %v785_v4 = vmul.f32 %v1421_v7, %v784_v8 }
  0xfb   :  { %v1423_v56 = vpop.eup %1422  ;;  %v771_v63 = vadd.f32 %v1419_v54, %v770_v62 }
  0xfc   :  { %v798_v58 = vmul.f32 %v1423_v56, %v766_v55  ;;  %v786_v28 = vadd.f32 %v1421_v7, %v785_v4  ;;  %vm803_vm10 = vweird.f32 %v1423_v56 }
  0xfd   :  { %v775_v27 = vsel %vm774_vm6, %v1419_v54, %v771_v63  ;;  %v806_v54 = vand.u32 2147483647, %v766_v55  ;;  %vm804_vm12 = vmor %vm802_vm11, %vm803_vm10 }
  0xfe   :  { %v799_v0 = vsub.f32 1.0, %v798_v58  ;;  %v780_v10 = vsel %vm777_vm7, %v779_v12, %v775_v27  ;;  %v790_v16 = vsel %vm789_vm8, %v1421_v7, %v786_v28  ;;  %v2386_v28 = vld [vmem:[#allocation55_spill] sm:$0xff] }
  0xff   :  { %v1425_v20 = vpop.eup %1424  ;;  %v795_v36 = vsel %vm792_vm9, %v794_v6, %v790_v16  ;;  %vm807_vm13 = vcmp.eq.f32.partialorder %v806_v54, 8.507059e+37 }
 0x100   :  { %v813_v8 = vmul.f32 0.0, %v795_v36  ;;  %v814_v23 = vmul.f32 %v1425_v20, %v780_v10  ;;  %v800_v52 = vmul.f32 %v1423_v56, %v799_v0 }
 0x102   :  { %v2171_v62 = vadd.f32 %v814_v23, %v813_v8  ;;  %v801_v60 = vadd.f32 %v1423_v56, %v800_v52 }
 0x104   :  { %1426 = vtanh.f32 %v2171_v62  ;;  %v805_v19 = vsel %vm804_vm12, %v1423_v56, %v801_v60 }
 0x105   :  { %v810_v3 = vsel %vm807_vm13, %v809_v59, %v805_v19 }
 0x10a   :  { %v1427_v7 = vpop.eup %1426 }
 0x10b   :  { %v817_v4 = vmul.f32 %v1427_v7, %v810_v3 }
 0x10d   :  { %834 = vmatmul.f32.vlgmr.msra.gmra.mxu0 %v817_v4  ;;  %854 = vmatmul.f32.vlgmr.msra.gmra.mxu1 %v817_v4 }
 0x10e   :  { %874 = vmatmul.f32.vlgmr.msra.gmra.mxu2 %v817_v4  ;;  %894 = vmatmul.f32.vlgmr.msra.gmra.mxu3 %v817_v4 }
 0x10f   :  { %1112 = vmatpush.msra.mxu0 %v1807_v17  ;;  %1132 = vmatpush.msra.mxu1 %v1809_v18  ;;  %v2357_v17 = vld [vmem:[#allocation21_spill] sm:$0xff]  ;;  %v2358_v18 = vld [vmem:[#allocation40_spill] sm:$0xff] }
 0x110   :  { %1152 = vmatpush.msra.mxu2 %v1813_v21  ;;  %1172 = vmatpush.msra.mxu3 %v1900_v49  ;;  %v2359_v21 = vld [vmem:[#allocation22_spill] sm:$0xff] }
 0x111   :  { %1113 = vmatpush.msra.mxu0 %v1815_v22  ;;  %1133 = vmatpush.msra.mxu1 %v1819_v24  ;;  %v2360_v22 = vld [vmem:[#allocation23_spill] sm:$0xff]  ;;  %v2361_v24 = vld [vmem:[#allocation24_spill] sm:$0xff] }
 0x112   :  { %1153 = vmatpush.msra.mxu2 %v1823_v25  ;;  %1173 = vmatpush.msra.mxu3 %v1913_v53  ;;  %v2362_v25 = vld [vmem:[#allocation41_spill] sm:$0xff]  ;;  %v2384_v53 = vld [vmem:[#allocation47_spill] sm:$0xff] }
 0x113   :  { %1114 = vmatpush.msra.mxu0 %v1825_v26  ;;  %1134 = vmatpush.msra.mxu1 %v2344_v15  ;;  %v2363_v26 = vld [vmem:[#allocation25_spill] sm:$0xff] }
 0x114   :  { %1154 = vmatpush.msra.mxu2 %v1834_v29  ;;  %1174 = vmatpush.msra.mxu3 %v1925_v57  ;;  %v2364_v29 = vld [vmem:[#allocation26_spill] sm:$0xff] }
 0x115   :  { %1115 = vmatpush.msra.mxu0 %v1836_v30  ;;  %1135 = vmatpush.msra.mxu1 %v1841_v31  ;;  %v2365_v30 = vld [vmem:[#allocation27_spill] sm:$0xff]  ;;  %v2366_v31 = vld [vmem:[#allocation42_spill] sm:$0xff] }
 0x116   :  { %1155 = vmatpush.msra.mxu2 %v1844_v32  ;;  %1175 = vmatpush.msra.mxu3 %v1937_v61  ;;  %v2367_v32 = vld [vmem:[#allocation28_spill] sm:$0xff] }
 0x117   :  { %1116 = vmatpush.msra.mxu0 %v1850_v33  ;;  %1136 = vmatpush.msra.mxu1 %v1852_v34  ;;  %v2368_v33 = vld [vmem:[#allocation29_spill] sm:$0xff]  ;;  %v2369_v34 = vld [vmem:[#allocation30_spill] sm:$0xff] }
 0x118   :  { %1156 = vmatpush.msra.mxu2 %v1855_v35  ;;  %1176 = vmatpush.msra.mxu3 %v1949_v1  ;;  %v2370_v35 = vld [vmem:[#allocation43_spill] sm:$0xff] }
 0x119   :  { %1117 = vmatpush.msra.mxu0 %v1862_v37  ;;  %1137 = vmatpush.msra.mxu1 %v1864_v38  ;;  %v2371_v37 = vld [vmem:[#allocation31_spill] sm:$0xff]  ;;  %v2372_v38 = vld [vmem:[#allocation32_spill] sm:$0xff] }
 0x11a   :  { %1157 = vmatpush.msra.mxu2 %v1868_v39  ;;  %1177 = vmatpush.msra.mxu3 %v1961_v5  ;;  %v2373_v39 = vld [vmem:[#allocation33_spill] sm:$0xff] }
 0x11b   :  { %1118 = vmatpush.msra.mxu0 %v1871_v40  ;;  %1138 = vmatpush.msra.mxu1 %v1873_v41  ;;  %v2374_v40 = vld [vmem:[#allocation44_spill] sm:$0xff]  ;;  %v2375_v41 = vld [vmem:[#allocation34_spill] sm:$0xff] }
 0x11c   :  { %1158 = vmatpush.msra.mxu2 %v1878_v42  ;;  %1178 = vmatpush.msra.mxu3 %v1973_v9  ;;  %v2376_v42 = vld [vmem:[#allocation35_spill] sm:$0xff]  ;;  %v2385_v9 = vld [vmem:[#allocation49_spill] sm:$0xff] }
 0x11d   :  { %1119 = vmatpush.msra.mxu0 %v1881_v43  ;;  %1139 = vmatpush.msra.mxu1 %v1883_v44  ;;  %v2377_v43 = vld [vmem:[#allocation36_spill] sm:$0xff]  ;;  %v2378_v44 = vld [vmem:[#allocation45_spill] sm:$0xff] }
 0x11e   :  { %1159 = vmatpush.msra.mxu2 %v1889_v45  ;;  %1179 = vmatpush.msra.mxu3 %v1985_v13  ;;  %v2379_v45 = vld [vmem:[#allocation37_spill] sm:$0xff] }
 0x11f   :  { %1120 = vmatpush.msra.mxu0 %v1892_v46  ;;  %1140 = vmatpush.msra.mxu1 %v1894_v47  ;;  %v2380_v46 = vld [vmem:[#allocation38_spill] sm:$0xff]  ;;  %v2381_v47 = vld [vmem:[#allocation39_spill] sm:$0xff] }
 0x120   :  { %1160 = vmatpush.msra.mxu2 %v1898_v48  ;;  %1180 = vmatpush.msra.mxu3 %v1991_v14  ;;  %v2382_v48 = vld [vmem:[#allocation46_spill] sm:$0xff] }
 0x121   :  { %1121 = vmatpush.msra.mxu0 %v1905_v50  ;;  %1141 = vmatpush.msra.mxu1 %v1907_v51  ;;  %v2383_v51 = vld [vmem:[#allocation20_spill] sm:$0xff] }
 0x122   :  { %1161 = vmatpush.msra.mxu2 %v2357_v17  ;;  %1181 = vmatpush.msra.mxu3 %v2358_v18 }
 0x123   :  { %1122 = vmatpush.msra.mxu0 %v2359_v21  ;;  %1142 = vmatpush.msra.mxu1 %v2360_v22 }
 0x124   :  { %1162 = vmatpush.msra.mxu2 %v2361_v24  ;;  %1182 = vmatpush.msra.mxu3 %v2362_v25 }
 0x125   :  { %1123 = vmatpush.msra.mxu0 %v2363_v26  ;;  %1143 = vmatpush.msra.mxu1 %v2364_v29 }
 0x126   :  { %1163 = vmatpush.msra.mxu2 %v2365_v30  ;;  %1183 = vmatpush.msra.mxu3 %v2366_v31 }
 0x127   :  { %1124 = vmatpush.msra.mxu0 %v2367_v32  ;;  %1144 = vmatpush.msra.mxu1 %v2368_v33 }
 0x128   :  { %1164 = vmatpush.msra.mxu2 %v2369_v34  ;;  %1184 = vmatpush.msra.mxu3 %v2370_v35 }
 0x129   :  { %1125 = vmatpush.msra.mxu0 %v2371_v37  ;;  %1145 = vmatpush.msra.mxu1 %v2372_v38 }
 0x12a   :  { %1165 = vmatpush.msra.mxu2 %v2373_v39  ;;  %1185 = vmatpush.msra.mxu3 %v2374_v40 }
 0x12b   :  { %1126 = vmatpush.msra.mxu0 %v2375_v41  ;;  %1146 = vmatpush.msra.mxu1 %v2376_v42 }
 0x12c   :  { %1166 = vmatpush.msra.mxu2 %v2377_v43  ;;  %1186 = vmatpush.msra.mxu3 %v2378_v44  ;;  %v2387_v44 = vld [vmem:[#allocation48_spill] sm:$0xff] }
 0x12d   :  { %1127 = vmatpush.msra.mxu0 %v2379_v45  ;;  %1147 = vmatpush.msra.mxu1 %v2380_v46  ;;  %v2388_v46 = vld [vmem:[#allocation50_spill] sm:$0xff] }
 0x12e   :  { %1167 = vmatpush.msra.mxu2 %v2381_v47  ;;  %1187 = vmatpush.msra.mxu3 %v2382_v48 }
 0x18a   :  { %v835_v49 = vpop.f32.mrf.mxu0  ;;  %v855_v50 = vpop.f32.mrf.mxu1 }
 0x18b   :  { %v898_v52 = vadd.f32 %v835_v49, %v2383_v51  ;;  %v899_v57 = vadd.f32 %v855_v50, %v2384_v53  ;;  %v2389_v51 = vld [vmem:[#allocation51_spill] sm:$0xff] }
 0x18d   :  { %v1386_v61 = vmul.f32 -1.442695, %v898_v52  ;;  %v1387_v1 = vmul.f32 -1.442695, %v899_v57 }
 0x18f   :  { %1428 = vpow2.f32 %v1386_v61 }
 0x190   :  { %1430 = vpow2.f32 %v1387_v1 }
 0x191   :  { %v875_v5 = vpop.f32.mrf.mxu2  ;;  %v895_v56 = vpop.f32.mrf.mxu3 }
 0x192   :  { %v900_v13 = vadd.f32 %v875_v5, %v2385_v9  ;;  %v901_v6 = vadd.f32 %v895_v56, %v2386_v28 }
 0x194   :  { %v1388_v14 = vmul.f32 -1.442695, %v900_v13 }
 0x195   :  { %v1429_v23 = vpop.eup %1428 }
 0x196   :  { %v1431_v15 = vpop.eup %1430  ;;  %v911_v55 = vadd.f32 1.0, %v1429_v23  ;;  %1432 = vpow2.f32 %v1388_v14 }
 0x197   :  { %v912_v11 = vadd.f32 1.0, %v1431_v15  ;;  %v2390_v15 = vld [vmem:[#allocation56_spill] sm:$0xff] }
 0x198   :  { %1434 = vrcp.f32 %v911_v55  ;;  %v925_v36 = vand.u32 2147483648, %v911_v55  ;;  %v923_v2 = vand.u32 2147483647, %v911_v55  ;;  %vm919_vm0 = vweird.f32 %v911_v55 }
 0x199   :  { %1436 = vrcp.f32 %v912_v11  ;;  %v940_v8 = vand.u32 2147483648, %v912_v11  ;;  %v938_v19 = vand.u32 2147483647, %v912_v11  ;;  %vm934_vm1 = vweird.f32 %v912_v11 }
 0x19a   :  { %v926_v4 = vor.u32 1.1754944e-38, %v925_v36  ;;  %vm924_vm4 = vcmp.eq.f32.partialorder %v923_v2, 8.507059e+37 }
 0x19b   :  { %v941_v18 = vor.u32 1.1754944e-38, %v940_v8  ;;  %vm939_vm5 = vcmp.eq.f32.partialorder %v938_v19, 8.507059e+37 }
 0x19c   :  { %v1433_v63 = vpop.eup %1432 }
 0x19d   :  { %v913_v58 = vadd.f32 1.0, %v1433_v63 }
 0x19e   :  { %v1435_v12 = vpop.eup %1434 }
 0x19f   :  { %v1437_v27 = vpop.eup %1436  ;;  %v915_v0 = vmul.f32 %v1435_v12, %v911_v55  ;;  %1438 = vrcp.f32 %v913_v58  ;;  %vm920_vm14 = vweird.f32 %v1435_v12  ;;  %v955_v35 = vand.u32 2147483648, %v913_v58 }
 0x1a0   :  { %v930_v10 = vmul.f32 %v1437_v27, %v912_v11  ;;  %1440 = vtanh.f32 %v901_v6  ;;  %vm935_vm15 = vweird.f32 %v1437_v27  ;;  %vm921_vm2 = vmor %vm919_vm0, %vm920_vm14  ;;  %vm949_vm7 = vweird.f32 %v913_v58 }
 0x1a1   :  { %v916_v16 = vsub.f32 1.0, %v915_v0  ;;  %vm936_vm3 = vmor %vm934_vm1, %vm935_vm15  ;;  %v953_v37 = vand.u32 2147483647, %v913_v58  ;;  %v956_v39 = vor.u32 1.1754944e-38, %v955_v35 }
 0x1a2   :  { %v931_v20 = vsub.f32 1.0, %v930_v10 }
 0x1a3   :  { %v917_v60 = vmul.f32 %v1435_v12, %v916_v16  ;;  %vm954_vm9 = vcmp.eq.f32.partialorder %v953_v37, 8.507059e+37  ;;  %v222_v37 = vld [vmem:[#allocation10 + $0x70] sm:$0xff] }
 0x1a4   :  { %v932_v54 = vmul.f32 %v1437_v27, %v931_v20 }
 0x1a5   :  { %v1439_v59 = vpop.eup %1438  ;;  %v918_v7 = vadd.f32 %v1435_v12, %v917_v60 }
 0x1a6   :  { %v945_v3 = vmul.f32 %v1439_v59, %v913_v58  ;;  %v933_v17 = vadd.f32 %v1437_v27, %v932_v54  ;;  %v1441_v22 = vpop.eup %1440  ;;  %vm950_vm6 = vweird.f32 %v1439_v59 }
 0x1a7   :  { %v922_v21 = vsel %vm921_vm2, %v1435_v12, %v918_v7  ;;  %vm951_vm8 = vmor %vm949_vm7, %vm950_vm6 }
 0x1a8   :  { %v946_v24 = vsub.f32 1.0, %v945_v3  ;;  %v927_v25 = vsel %vm924_vm4, %v926_v4, %v922_v21  ;;  %v937_v26 = vsel %vm936_vm3, %v1437_v27, %v933_v17 }
 0x1a9   :  { %v942_v29 = vsel %vm939_vm5, %v941_v18, %v937_v26  ;;  %v961_v30 = vmul.f32 %v1441_v22, %v927_v25 }
 0x1aa   :  { %v960_v31 = vmul.f32 %v942_v29, %v2171_v62  ;;  %v947_v32 = vmul.f32 %v1439_v59, %v946_v24 }
 0x1ac   :  { %v2243_v33 = vadd.f32 %v961_v30, %v960_v31  ;;  %v948_v34 = vadd.f32 %v1439_v59, %v947_v32 }
 0x1ae   :  { %1442 = vtanh.f32 %v2243_v33  ;;  %v952_v38 = vsel %vm951_vm8, %v1439_v59, %v948_v34 }
 0x1af   :  { %v957_v41 = vsel %vm954_vm9, %v956_v39, %v952_v38  ;;  %v221_v38 = vld [vmem:[#allocation10 + $0x68] sm:$0xff]  ;;  %v220_v39 = vld [vmem:[#allocation10 + $0x60] sm:$0xff] }
 0x1b4   :  { %v1443_v40 = vpop.eup %1442 }
 0x1b5   :  { %v964_v42 = vmul.f32 %v1443_v40, %v957_v41  ;;  %v219_v40 = vld [vmem:[#allocation10 + $0x58] sm:$0xff]  ;;  %v218_v41 = vld [vmem:[#allocation10 + $0x50] sm:$0xff] }
 0x1b7   :  { %981 = vmatmul.f32.vlgmr.msrb.gmra.mxu0 %v964_v42  ;;  %1001 = vmatmul.f32.vlgmr.msrb.gmra.mxu1 %v964_v42 }
 0x1b8   :  { %1021 = vmatmul.f32.vlgmr.msrb.gmra.mxu2 %v964_v42  ;;  %1041 = vmatmul.f32.vlgmr.msrb.gmra.mxu3 %v964_v42  ;;  %v217_v42 = vld [vmem:[#allocation10 + $0x48] sm:$0xff] }
 0x234   :  { %v982_v62 = vpop.f32.mrf.mxu0  ;;  %v1002_v43 = vpop.f32.mrf.mxu1 }
 0x235   :  { %v1045_v45 = vadd.f32 %v982_v62, %v2387_v44  ;;  %v1046_v47 = vadd.f32 %v1002_v43, %v2388_v46  ;;  %v216_v62 = vld [vmem:[#allocation10 + $0x40] sm:$0xff]  ;;  %v215_v43 = vld [vmem:[#allocation10 + $0x38] sm:$0xff]  ;;  %v214_v44 = vld [vmem:[#allocation10 + $0x30] sm:$0xff] }
 0x237   :  { %v1389_v48 = vmul.f32 -1.442695, %v1045_v45  ;;  %v1390_v49 = vmul.f32 -1.442695, %v1046_v47  ;;  %v2391_v47 = vld [vmem:[#allocation52_spill] sm:$0xff] }
 0x239   :  { %1444 = vpow2.f32 %v1389_v48 }
 0x23a   :  { %1446 = vpow2.f32 %v1390_v49  ;;  %v2392_v49 = vld [vmem:[#allocation53_spill] sm:$0xff] }
 0x23b   :  { %v1022_v50 = vpop.f32.mrf.mxu2  ;;  %v1042_v9 = vpop.f32.mrf.mxu3 }
 0x23c   :  { %v1047_v52 = vadd.f32 %v1022_v50, %v2389_v51  ;;  %v1048_v55 = vadd.f32 %v1042_v9, %v2390_v15  ;;  %v213_v51 = vld [vmem:[#allocation10 + $0x28] sm:$0xff] }
 0x23d   :  { %v209_v9 = vld [vmem:[#allocation10 + $0x8] sm:$0xff] }
 0x23e   :  { %v1391_v53 = vmul.f32 -1.442695, %v1047_v52 }
 0x23f   :  { %v1445_v57 = vpop.eup %1444 }
 0x240   :  { %v1447_v61 = vpop.eup %1446  ;;  %v1058_v1 = vadd.f32 1.0, %v1445_v57  ;;  %1448 = vpow2.f32 %v1391_v53  ;;  %v212_v57 = vld [vmem:[#allocation10 + $0x20] sm:$0xff] }
 0x241   :  { %v1059_v5 = vadd.f32 1.0, %v1447_v61  ;;  %v211_v61 = vld [vmem:[#allocation10 + $0x18] sm:$0xff] }
 0x242   :  { %1450 = vrcp.f32 %v1058_v1  ;;  %v1072_v28 = vand.u32 2147483648, %v1058_v1  ;;  %v1070_v0 = vand.u32 2147483647, %v1058_v1  ;;  %vm1066_vm12 = vweird.f32 %v1058_v1 }
 0x243   :  { %1452 = vrcp.f32 %v1059_v5  ;;  %v1087_v6 = vand.u32 2147483648, %v1059_v5  ;;  %v1085_v16 = vand.u32 2147483647, %v1059_v5  ;;  %vm1081_vm13 = vweird.f32 %v1059_v5 }
 0x244   :  { %v1073_v60 = vor.u32 1.1754944e-38, %v1072_v28  ;;  %vm1071_vm0 = vcmp.eq.f32.partialorder %v1070_v0, 8.507059e+37  ;;  %v238_v28 = vld [vmem:[#allocation11 + $0x68] sm:$0xff] }
 0x245   :  { %v1088_v54 = vor.u32 1.1754944e-38, %v1087_v6  ;;  %vm1086_vm1 = vcmp.eq.f32.partialorder %v1085_v16, 8.507059e+37  ;;  %v236_v16 = vld [vmem:[#allocation11 + $0x58] sm:$0xff] }
 0x246   :  { %v1449_v13 = vpop.eup %1448 }
 0x247   :  { %v1060_v14 = vadd.f32 1.0, %v1449_v13  ;;  %v2393_v13 = vld [vmem:[#allocation54_spill] sm:$0xff] }
 0x248   :  { %v1451_v23 = vpop.eup %1450 }
 0x249   :  { %v1453_v11 = vpop.eup %1452  ;;  %v1062_v56 = vmul.f32 %v1451_v23, %v1058_v1  ;;  %1454 = vrcp.f32 %v1060_v14  ;;  %vm1067_vm10 = vweird.f32 %v1451_v23  ;;  %v1102_v26 = vand.u32 2147483648, %v1060_v14  ;;  %v210_v1 = vld [vmem:[#allocation10 + $0x10] sm:$0xff] }
 0x24a   :  { %v1077_v63 = vmul.f32 %v1453_v11, %v1059_v5  ;;  %1456 = vtanh.f32 %v1048_v55  ;;  %vm1082_vm11 = vweird.f32 %v1453_v11  ;;  %vm1068_vm14 = vmor %vm1066_vm12, %vm1067_vm10  ;;  %vm1096_vm3 = vweird.f32 %v1060_v14 }
 0x24b   :  { %v1063_v58 = vsub.f32 1.0, %v1062_v56  ;;  %vm1083_vm15 = vmor %vm1081_vm13, %vm1082_vm11  ;;  %v1100_v29 = vand.u32 2147483647, %v1060_v14  ;;  %v1103_v31 = vor.u32 1.1754944e-38, %v1102_v26 }
 0x24c   :  { %v1078_v12 = vsub.f32 1.0, %v1077_v63 }
 0x24d   :  { %v1064_v27 = vmul.f32 %v1451_v23, %v1063_v58  ;;  %vm1101_vm5 = vcmp.eq.f32.partialorder %v1100_v29, 8.507059e+37  ;;  %v240_v58 = vld [vmem:[#allocation11 + $0x78] sm:$0xff] }
 0x24e   :  { %v1079_v10 = vmul.f32 %v1453_v11, %v1078_v12  ;;  %v239_v12 = vld [vmem:[#allocation11 + $0x70] sm:$0xff]  ;;  %1286 = vmatpush.msrb.mxu1 %v240_v58  ;;  %v250_v58 = vld [vmem:[#allocation13 + $0x40] sm:$0xff] }
 0x24f   :  { %v1455_v20 = vpop.eup %1454  ;;  %v1065_v36 = vadd.f32 %v1451_v23, %v1064_v27  ;;  %v237_v27 = vld [vmem:[#allocation11 + $0x60] sm:$0xff] }
 0x250   :  { %v1092_v8 = vmul.f32 %v1455_v20, %v1060_v14  ;;  %v1080_v2 = vadd.f32 %v1453_v11, %v1079_v10  ;;  %v1457_v59 = vpop.eup %1456  ;;  %vm1097_vm2 = vweird.f32 %v1455_v20  ;;  %1287 = vmatpush.msrb.mxu1 %v239_v12  ;;  %v249_v12 = vld [vmem:[#allocation13 + $0x38] sm:$0xff] }
 0x251   :  { %v1069_v19 = vsel %vm1068_vm14, %v1451_v23, %v1065_v36  ;;  %vm1098_vm4 = vmor %vm1096_vm3, %vm1097_vm2  ;;  %v208_v23 = vld [vmem:[#allocation10] sm:$0xff]  ;;  %v2394_v36 = vld [vmem:[#allocation57_spill] sm:$0xff] }
 0x252   :  { %v1093_v7 = vsub.f32 1.0, %v1092_v8  ;;  %v1074_v3 = vsel %vm1071_vm0, %v1073_v60, %v1069_v19  ;;  %v1084_v4 = vsel %vm1083_vm15, %v1453_v11, %v1080_v2  ;;  %1288 = vmatpush.msrb.mxu1 %v238_v28  ;;  %v248_v28 = vld [vmem:[#allocation13 + $0x30] sm:$0xff] }
 0x253   :  { %v1089_v17 = vsel %vm1086_vm1, %v1088_v54, %v1084_v4  ;;  %v1108_v18 = vmul.f32 %v1457_v59, %v1074_v3  ;;  %v235_v54 = vld [vmem:[#allocation11 + $0x50] sm:$0xff] }
 0x254   :  { %v1107_v21 = vmul.f32 %v1089_v17, %v2243_v33  ;;  %v1094_v22 = vmul.f32 %v1455_v20, %v1093_v7  ;;  %v223_v33 = vld [vmem:[#allocation10 + $0x78] sm:$0xff]  ;;  %1289 = vmatpush.msrb.mxu1 %v237_v27  ;;  %v234_v7 = vld [vmem:[#allocation11 + $0x48] sm:$0xff]  ;;  %v246_v27 = vld [vmem:[#allocation13 + $0x20] sm:$0xff] }
 0x255   :  { %1262 = vmatpush.msrb.mxu0 %v223_v33 }
 0x256   :  { %v2251_v24 = vadd.f32 %v1108_v18, %v1107_v21  ;;  %v1095_v25 = vadd.f32 %v1455_v20, %v1094_v22  ;;  %1290 = vmatpush.msrb.mxu1 %v236_v16  ;;  %v233_v22 = vld [vmem:[#allocation11 + $0x40] sm:$0xff] }
 0x257   :  { %1263 = vmatpush.msrb.mxu0 %v222_v37 }
 0x258   :  { %1458 = vtanh.f32 %v2251_v24  ;;  %v1099_v30 = vsel %vm1098_vm4, %v1455_v20, %v1095_v25  ;;  %1291 = vmatpush.msrb.mxu1 %v235_v54  ;;  %v1410_v54 = vld [vmem:[%s2285_s7] ss:$0 sm:$0xff] }
 0x259   :  { %v1104_v34 = vsel %vm1101_vm5, %v1103_v31, %v1099_v30  ;;  %1264 = vmatpush.msrb.mxu0 %v221_v38  ;;  %v232_v31 = vld [vmem:[#allocation11 + $0x38] sm:$0xff]  ;;  %v231_v38 = vld [vmem:[#allocation11 + $0x30] sm:$0xff] }
 0x25a   :  { %1292 = vmatpush.msrb.mxu1 %v234_v7 }
 0x25b   :  { %1265 = vmatpush.msrb.mxu0 %v220_v39 }
 0x25c   :  { %1293 = vmatpush.msrb.mxu1 %v233_v22 }
 0x25d   :  { %1266 = vmatpush.msrb.mxu0 %v219_v40 }
 0x25e   :  { %v1459_v32 = vpop.eup %1458  ;;  %1294 = vmatpush.msrb.mxu1 %v232_v31 }
 0x25f   :  { %v1111_v35 = vmul.f32 %v1459_v32, %v1104_v34  ;;  %1267 = vmatpush.msrb.mxu0 %v218_v41 }
 0x260   :  { %1295 = vmatpush.msrb.mxu1 %v231_v38 }
 0x261   :  { %1128 = vmatmul.f32.vlgmr.msra.gmra.mxu0 %v1111_v35  ;;  %1148 = vmatmul.f32.vlgmr.msra.gmra.mxu1 %v1111_v35 }
 0x262   :  { %1168 = vmatmul.f32.vlgmr.msra.gmra.mxu2 %v1111_v35  ;;  %1188 = vmatmul.f32.vlgmr.msra.gmra.mxu3 %v1111_v35 }
 0x263   :  { %1268 = vmatpush.msrb.mxu0 %v217_v42 }
 0x265   :  { %1269 = vmatpush.msrb.mxu0 %v216_v62 }
 0x267   :  { %1270 = vmatpush.msrb.mxu0 %v215_v43 }
 0x269   :  { %1271 = vmatpush.msrb.mxu0 %v214_v44  ;;  %v230_v44 = vld [vmem:[#allocation11 + $0x28] sm:$0xff] }
 0x26a   :  { %1296 = vmatpush.msrb.mxu1 %v230_v44 }
 0x26b   :  { %1272 = vmatpush.msrb.mxu0 %v213_v51 }
 0x26d   :  { %1273 = vmatpush.msrb.mxu0 %v212_v57 }
 0x26f   :  { %1274 = vmatpush.msrb.mxu0 %v211_v61 }
 0x271   :  { %1275 = vmatpush.msrb.mxu0 %v210_v1 }
 0x273   :  { %1276 = vmatpush.msrb.mxu0 %v209_v9  ;;  %v226_v9 = vld [vmem:[#allocation11 + $0x8] sm:$0xff] }
 0x275   :  { %1277 = vmatpush.msrb.mxu0 %v208_v23  ;;  %v256_v23 = vld [vmem:[#allocation13 + $0x70] sm:$0xff] }
 0x2de   :  { %v1129_v45 = vpop.f32.mrf.mxu0  ;;  %v1149_v46 = vpop.f32.mrf.mxu1 }
 0x2df   :  { %v1192_v48 = vadd.f32 %v1129_v45, %v2391_v47  ;;  %v1193_v50 = vadd.f32 %v1149_v46, %v2392_v49  ;;  %v229_v47 = vld [vmem:[#allocation11 + $0x20] sm:$0xff] }
 0x2e0   :  { %1297 = vmatpush.msrb.mxu1 %v229_v47 }
 0x2e1   :  { %v1392_v52 = vmul.f32 -1.442695, %v1192_v48  ;;  %v1393_v53 = vmul.f32 -1.442695, %v1193_v50  ;;  %v228_v50 = vld [vmem:[#allocation11 + $0x18] sm:$0xff] }
 0x2e2   :  { %1298 = vmatpush.msrb.mxu1 %v228_v50 }
 0x2e3   :  { %1460 = vpow2.f32 %v1392_v52 }
 0x2e4   :  { %1462 = vpow2.f32 %v1393_v53 }
 0x2e5   :  { %v1169_v5 = vpop.f32.mrf.mxu2  ;;  %v1189_v6 = vpop.f32.mrf.mxu3 }
 0x2e6   :  { %v1194_v14 = vadd.f32 %v1169_v5, %v2393_v13  ;;  %v1195_v8 = vadd.f32 %v1189_v6, %v2394_v36  ;;  %v227_v5 = vld [vmem:[#allocation11 + $0x10] sm:$0xff]  ;;  %v225_v13 = vld [vmem:[#allocation11] sm:$0xff]  ;;  %v247_v6 = vld [vmem:[#allocation13 + $0x28] sm:$0xff] }
 0x2e7   :  { %1299 = vmatpush.msrb.mxu1 %v227_v5 }
 0x2e8   :  { %v1394_v15 = vmul.f32 -1.442695, %v1194_v14  ;;  %v257_v14 = vld [vmem:[#allocation13 + $0x78] sm:$0xff] }
 0x2e9   :  { %v1461_v55 = vpop.eup %1460  ;;  %1300 = vmatpush.msrb.mxu1 %v226_v9  ;;  %1310 = vmatpush.msrb.mxu2 %v257_v14 }
 0x2ea   :  { %v1463_v11 = vpop.eup %1462  ;;  %v1205_v56 = vadd.f32 1.0, %v1461_v55  ;;  %1464 = vpow2.f32 %v1394_v15  ;;  %v255_v15 = vld [vmem:[#allocation13 + $0x68] sm:$0xff]  ;;  %v254_v55 = vld [vmem:[#allocation13 + $0x60] sm:$0xff] }
 0x2eb   :  { %v1206_v63 = vadd.f32 1.0, %v1463_v11  ;;  %1301 = vmatpush.msrb.mxu1 %v225_v13  ;;  %1311 = vmatpush.msrb.mxu2 %v256_v23  ;;  %v253_v11 = vld [vmem:[#allocation13 + $0x58] sm:$0xff] }
 0x2ec   :  { %1466 = vrcp.f32 %v1205_v56  ;;  %v1219_v4 = vand.u32 2147483648, %v1205_v56  ;;  %v1217_v21 = vand.u32 2147483647, %v1205_v56  ;;  %vm1213_vm8 = vweird.f32 %v1205_v56 }
 0x2ed   :  { %1468 = vrcp.f32 %v1206_v63  ;;  %v1234_v17 = vand.u32 2147483648, %v1206_v63  ;;  %v1232_v26 = vand.u32 2147483647, %v1206_v63  ;;  %vm1228_vm9 = vweird.f32 %v1206_v63  ;;  %1312 = vmatpush.msrb.mxu2 %v255_v15 }
 0x2ee   :  { %v1220_v34 = vor.u32 1.1754944e-38, %v1219_v4  ;;  %vm1218_vm12 = vcmp.eq.f32.partialorder %v1217_v21, 8.507059e+37 }
 0x2ef   :  { %v1235_v33 = vor.u32 1.1754944e-38, %v1234_v17  ;;  %vm1233_vm13 = vcmp.eq.f32.partialorder %v1232_v26, 8.507059e+37  ;;  %1313 = vmatpush.msrb.mxu2 %v254_v55 }
 0x2f0   :  { %v1465_v0 = vpop.eup %1464 }
 0x2f1   :  { %v2257_v10 = vadd.f32 1.0, %v1465_v0  ;;  %1314 = vmatpush.msrb.mxu2 %v253_v11  ;;  %v245_v0 = vld [vmem:[#allocation13 + $0x18] sm:$0xff] }
 0x2f2   :  { %v1467_v20 = vpop.eup %1466 }
 0x2f3   :  { %v1469_v60 = vpop.eup %1468  ;;  %v1209_v2 = vmul.f32 %v1467_v20, %v1205_v56  ;;  %1470 = vrcp.f32 %v2257_v10  ;;  %vm1214_vm6 = vweird.f32 %v1467_v20  ;;  %v1249_v51 = vand.u32 2147483648, %v2257_v10  ;;  %v252_v56 = vld [vmem:[#allocation13 + $0x50] sm:$0xff] }
 0x2f4   :  { %v1224_v19 = vmul.f32 %v1469_v60, %v1206_v63  ;;  %1472 = vtanh.f32 %v1195_v8  ;;  %vm1229_vm7 = vweird.f32 %v1469_v60  ;;  %vm1215_vm10 = vmor %vm1213_vm8, %vm1214_vm6  ;;  %vm1243_vm15 = vweird.f32 %v2257_v10  ;;  %v251_v63 = vld [vmem:[#allocation13 + $0x48] sm:$0xff]  ;;  %1315 = vmatpush.msrb.mxu2 %v252_v56  ;;  %v244_v8 = vld [vmem:[#allocation13 + $0x10] sm:$0xff] }
 0x2f5   :  { %v1210_v59 = vsub.f32 1.0, %v1209_v2  ;;  %vm1230_vm11 = vmor %vm1228_vm9, %vm1229_vm7  ;;  %v1247_v52 = vand.u32 2147483647, %v2257_v10  ;;  %v242_v2 = vld [vmem:[#allocation13] sm:$0xff] }
 0x2f6   :  { %v1225_v3 = vsub.f32 1.0, %v1224_v19  ;;  %1316 = vmatpush.msrb.mxu2 %v251_v63 }
 0x2f7   :  { %v1211_v18 = vmul.f32 %v1467_v20, %v1210_v59  ;;  %vm1248_vm1 = vcmp.eq.f32.partialorder %v1247_v52, 8.507059e+37 }
 0x2f8   :  { %v1226_v25 = vmul.f32 %v1469_v60, %v1225_v3  ;;  %1317 = vmatpush.msrb.mxu2 %v250_v58  ;;  %v1411_v3 = vld [vmem:[%s2287_s9] ss:$0 sm:$0xff] }
 0x2f9   :  { %v1471_v29 = vpop.eup %1470  ;;  %v1212_v30 = vadd.f32 %v1467_v20, %v1211_v18 }
 0x2fa   :  { %v1239_v32 = vmul.f32 %v1471_v29, %v2257_v10  ;;  %v1227_v35 = vadd.f32 %v1469_v60, %v1226_v25  ;;  %v1473_v39 = vpop.eup %1472  ;;  %vm1244_vm14 = vweird.f32 %v1471_v29  ;;  %1318 = vmatpush.msrb.mxu2 %v249_v12  ;;  %v1409_v10 = vld [vmem:[%s2283_s5] ss:$0 sm:$0xff] }
 0x2fb   :  { %v1216_v37 = vsel %vm1215_vm10, %v1467_v20, %v1212_v30  ;;  %vm1245_vm0 = vmor %vm1243_vm15, %vm1244_vm14 }
 0x2fc   :  { %v1240_v40 = vsub.f32 1.0, %v1239_v32  ;;  %v1221_v41 = vsel %vm1218_vm12, %v1220_v34, %v1216_v37  ;;  %v1231_v42 = vsel %vm1230_vm11, %v1469_v60, %v1227_v35  ;;  %1319 = vmatpush.msrb.mxu2 %v248_v28  ;;  %v243_v60 = vld [vmem:[#allocation13 + $0x8] sm:$0xff] }
 0x2fd   :  { %v1236_v62 = vsel %vm1233_vm13, %v1235_v33, %v1231_v42  ;;  %v1255_v43 = vmul.f32 %v1473_v39, %v1221_v41 }
 0x2fe   :  { %v1254_v45 = vmul.f32 %v1236_v62, %v2251_v24  ;;  %v1241_v46 = vmul.f32 %v1471_v29, %v1240_v40  ;;  %v1250_v24 = vor.u32 1.1754944e-38, %v1249_v51  ;;  %1320 = vmatpush.msrb.mxu2 %v247_v6 }
 0x300   :  { %v1256_v48 = vadd.f32 %v1255_v43, %v1254_v45  ;;  %v1242_v49 = vadd.f32 %v1471_v29, %v1241_v46  ;;  %1321 = vmatpush.msrb.mxu2 %v246_v27 }
 0x302   :  { %1474 = vtanh.f32 %v1256_v48  ;;  %v1246_v53 = vsel %vm1245_vm0, %v1471_v29, %v1242_v49  ;;  %1322 = vmatpush.msrb.mxu2 %v245_v0 }
 0x303   :  { %v1251_v61 = vsel %vm1248_vm1, %v1250_v24, %v1246_v53 }
 0x304   :  { %1323 = vmatpush.msrb.mxu2 %v244_v8 }
 0x306   :  { %1324 = vmatpush.msrb.mxu2 %v243_v60 }
 0x308   :  { %v1475_v57 = vpop.eup %1474  ;;  %1325 = vmatpush.msrb.mxu2 %v242_v2 }
 0x309   :  { %v1258_v1 = vmul.f32 %v1475_v57, %v1251_v61 }
 0x30b   :  { %1278 = vmatmul.f32.vlgmr.msrb.gmra.mxu0 %v1258_v1 }
 0x388   :  { %v1279_v16 = vpop.f32.mrf.mxu0 }
 0x389   :  { %v1280_v20 = vadd.f32 %v1409_v10, %v1279_v16 }
 0x38b   :  { %v1282_v36 = vmax.f32 %v1280_v20, 0.0 }
 0x38d   :  { %1302 = vmatmul.f32.vlgmr.msrb.gmra.mxu1 %v1282_v36 }
 0x40a   :  { %v1303_v19 = vpop.f32.mrf.mxu1 }
 0x40b   :  { %v1304_v59 = vadd.f32 %v1410_v54, %v1303_v19 }
 0x40d   :  { %v1306_v7 = vmax.f32 %v1304_v59, 0.0 }
 0x40f   :  { %1326 = vmatmul.f32.vlgmr.msrb.gmra.mxu2 %v1306_v7 }
 0x492   :  { %v1327_v4 = vpop.f32.mrf.mxu2 }
 0x493   :  { %v1328_v17 = vadd.f32 %v1411_v3, %v1327_v4 }
 0x495   :  { %1330 = vst [vmem:[#allocation14] sm:$0x3] %v1328_v17 }
 0x496   :  { %1341 = dma.vmem_to_hbm [thread:$0]  %s1337_s3, 32, %s1339_s13, [#allocation4]  }
 0x497   :  { %1676 = dma.done.wait [#allocation4], 32  }
 0x498   :  { %1677 = vsyncadd [#allocation4], 4294967264 }
 0x499   :  { %1346 = vsyncpa [#allocation3], 1 }
 0x49a   :  { %1347 = vsyncpa [#allocation6], 1 }
 0x49b   :  { %1348 = vsyncpa [#allocation9], 1 }
 0x49c   :  { %1349 = vsyncpa [#allocation12], 1 }
 0x49d   :  { %1350 = vsyncpa [#allocation4], 1 }

</bundles_post_ra>
